<compile_context>
chip_gen: v5e
topology: v5e:2x2
jax: 0.10.0
libtpu: 0.0.40
codegen_flags: <defaults>
</compile_context>

<pallas_src>
import functools

import jax
import jax.numpy as jnp
from jax.experimental import pallas as pl
from jax.experimental.pallas import tpu as pltpu


def _conv_tap_kernel(x_ref, w_ref, b_ref, o_ref, *, k, th, w_out, stride, apply_lrelu):
    """Fused reflection-padded conv for one (batch, row-tile) grid step.

    x_ref : (Hp, C_in, Wp)        padded image of this batch element (bf16/f32)
    w_ref : (k*k, C_out, C_in)    tap-major conv weight
    b_ref : (C_out, 1)            bias (f32)
    o_ref : (th, C_out, W_out)    output rows h0 .. h0+th-1 (H, C, W order)
    """
    j = pl.program_id(1)
    h0 = j * th
    c_out = w_ref.shape[1]
    c_in = w_ref.shape[2]

    acc = jnp.zeros((th, c_out, w_out), jnp.float32)
    # Static k*k tap loop (fully unrolled at trace time): each tap is a batched
    # (C_out,C_in)@(C_in,W_out) matmul over the th rows of this tile, accumulated in
    # f32 on the MXU (preferred_element_type=f32).
    for dy in range(k):
        for dx in range(k):
            if stride == 1:
                win = x_ref[pl.ds(h0 + dy, th), :, dx:dx + w_out]
            else:
                win = x_ref[pl.ds(h0 * stride + dy, th, stride=stride), :,
                            pl.ds(dx, w_out, stride=stride)]
            # win: (th, C_in, W_out); broadcast the tiny tap weight over the row batch.
            w_tap = jnp.broadcast_to(w_ref[dy * k + dx][None], (th, c_out, c_in))
            acc = acc + jnp.einsum("toc,tcw->tow", w_tap, win,
                                   preferred_element_type=jnp.float32)

    acc = acc + b_ref[...][None]             # (1, C_out, 1) broadcast over (th, ., W)
    if apply_lrelu:
        acc = jnp.maximum(acc, 0.01 * acc)   # leaky_relu, negative slope 0.01
    o_ref[...] = acc.astype(o_ref.dtype)


def conv_layer_forward(x, weight, bias, *, kernel_size, stride=1, is_last=False,
                       rows_per_step=8, use_bf16=True):
    """Pallas equivalent of ConvLayer.forward. x: (N, C_in, H, W) NCHW.

    rows_per_step: output rows computed per grid step (raise to 32-64 for large
    images to amortize the ~0.35us per-step overhead; kept small here so the demo
    exercises the multi-tile path).
    """
    n, c_in, h, w = x.shape
    c_out = weight.shape[0]
    k = kernel_size
    pad = k // 2

    # ReflectionPad2d, then put channels on sublanes / W on lanes: (N, Hp, C_in, Wp).
    # pad + transpose + cast fuse into a single XLA pass over the input.
    xp = jnp.pad(x, ((0, 0), (0, 0), (pad, pad), (pad, pad)), mode="reflect")
    hp, wp = h + 2 * pad, w + 2 * pad
    h_out = (hp - k) // stride + 1
    w_out = (wp - k) // stride + 1

    compute_dtype = jnp.bfloat16 if use_bf16 else x.dtype
    xpt = jnp.transpose(xp, (0, 2, 1, 3)).astype(compute_dtype)          # (N,Hp,C,Wp)
    # Tap-major weight: wt[dy*k+dx, co, ci] = weight[co, ci, dy, dx]
    wt = jnp.transpose(weight, (2, 3, 0, 1)).reshape(k * k, c_out, c_in)
    wt = wt.astype(compute_dtype)
    b2 = bias.reshape(c_out, 1).astype(jnp.float32)

    # Rows per grid step must divide H_out (last block would otherwise read OOB rows).
    th = min(int(rows_per_step), h_out)
    while h_out % th:
        th -= 1
    grid = (n, h_out // th)

    # Advisory cost estimate for the XLA scheduler.
    flops = 2 * n * h_out * w_out * c_out * c_in * k * k
    out_bytes = n * h_out * c_out * w_out * jnp.dtype(x.dtype).itemsize
    bytes_accessed = (int(xpt.size) * jnp.dtype(compute_dtype).itemsize
                      + int(wt.size) * jnp.dtype(compute_dtype).itemsize
                      + int(b2.size) * 4 + out_bytes)
    cost = pl.CostEstimate(flops=flops, transcendentals=0,
                           bytes_accessed=bytes_accessed)

    # Raise the scoped VMEM limit only when the (double-buffered) per-image block
    # needs it; never ask for more than the 64 MiB v7x physical budget.
    itemsize = jnp.dtype(compute_dtype).itemsize
    vmem_need = (2 * (hp * c_in * wp * itemsize
                      + th * c_out * w_out * jnp.dtype(x.dtype).itemsize)
                 + k * k * c_out * c_in * itemsize + c_out * 4)
    vmem_limit = None
    if vmem_need > 32 * 1024 * 1024:
        vmem_limit = min(2 * vmem_need, 64 * 1024 * 1024)

    kernel = functools.partial(_conv_tap_kernel, k=k, th=th, w_out=w_out,
                               stride=stride, apply_lrelu=(not is_last))

    out_nhcw = pl.pallas_call(
        kernel,
        out_shape=jax.ShapeDtypeStruct((n, h_out, c_out, w_out), x.dtype),
        grid_spec=pltpu.PrefetchScalarGridSpec(
            num_scalar_prefetch=0,
            grid=grid,
            in_specs=[
                # Whole padded image per batch element; block index only depends on the
                # batch axis, so it stays resident across the inner row-tile axis.
                pl.BlockSpec((None, hp, c_in, wp), lambda ni, ji: (ni, 0, 0, 0)),
                pl.BlockSpec((k * k, c_out, c_in), lambda ni, ji: (0, 0, 0)),
                pl.BlockSpec((c_out, 1), lambda ni, ji: (0, 0)),
            ],
            out_specs=pl.BlockSpec((None, th, c_out, w_out),
                                   lambda ni, ji: (ni, ji, 0, 0)),
        ),
        compiler_params=pltpu.CompilerParams(
            dimension_semantics=("parallel", "parallel"),
            vmem_limit_bytes=vmem_limit,
        ),
        cost_estimate=cost,
    )(xpt, wt, b2)

    # (N, H, C, W) -> (N, C, H, W): cheap H<->C swap, W (lane-dense) untouched.
    return jnp.transpose(out_nhcw, (0, 2, 1, 3))


def _reference(x, weight, bias, *, kernel_size, stride, is_last):
    # Pure-JAX reference for correctness checking.
    pad = kernel_size // 2
    xp = jnp.pad(x, ((0, 0), (0, 0), (pad, pad), (pad, pad)), mode="reflect")
    out = jax.lax.conv_general_dilated(
        xp, weight, window_strides=(stride, stride), padding="VALID",
        dimension_numbers=("NCHW", "OIHW", "NCHW"))
    out = out + bias.reshape(1, -1, 1, 1)
    if not is_last:
        out = jnp.where(out > 0, out, 0.01 * out)
    return out


if __name__ == "__main__":
    # Small shapes consistent with the module's forward.
    N, C_IN, H, W = 2, 4, 16, 16
    C_OUT, KSIZE, STRIDE = 8, 3, 1
    IS_LAST = False

    key = jax.random.PRNGKey(0)
    kx, kw, kb = jax.random.split(key, 3)
    x = jax.random.normal(kx, (N, C_IN, H, W), dtype=jnp.float32)
    # Conv2d weight: (C_out, C_in, k, k); bias: (C_out,)
    weight = 0.1 * jax.random.normal(kw, (C_OUT, C_IN, KSIZE, KSIZE), dtype=jnp.float32)
    bias = 0.1 * jax.random.normal(kb, (C_OUT,), dtype=jnp.float32)

    out = conv_layer_forward(x, weight, bias, kernel_size=KSIZE, stride=STRIDE,
                             is_last=IS_LAST)
    out = jax.block_until_ready(out)

    ref = _reference(x, weight, bias, kernel_size=KSIZE, stride=STRIDE, is_last=IS_LAST)
    assert out.shape == ref.shape == (N, C_OUT, H, W)
    # Tolerance loosened because the kernel's dot inputs are bf16 (f32 accumulation).
    assert jnp.allclose(out, ref, atol=3e-2, rtol=3e-2)

    print("KERNEL_OK")
</pallas_src>

<mosaic_0001>
module attributes {stable_mosaic.version = 11 : i64} {
  func.func @_conv_tap_kernel(%arg0: i32, %arg1: i32, %arg2: memref<1x18x4x18xbf16, #tpu.memory_space<vmem>>, %arg3: memref<9x8x4xbf16, #tpu.memory_space<vmem>>, %arg4: memref<8x1xf32, #tpu.memory_space<vmem>>, %arg5: memref<1x8x8x16xf32, #tpu.memory_space<vmem>>) attributes {dimension_semantics = [#tpu.dimension_semantics<parallel>, #tpu.dimension_semantics<parallel>], iteration_bounds = array<i64: 2, 2>, scalar_prefetch = 0 : i64, scratch_operands = 0 : i64, tpu.core_type = #tpu.core_type<tc>, window_params = [{transform_indices = @transform_0, window_bounds = array<i64: 1, 18, 4, 18>}, {pipeline_mode = #tpu.pipeline_mode<synchronous>, transform_indices = @transform_1, window_bounds = array<i64: 9, 8, 4>}, {pipeline_mode = #tpu.pipeline_mode<synchronous>, transform_indices = @transform_2, window_bounds = array<i64: 8, 1>}, {transform_indices = @transform_3, window_bounds = array<i64: 1, 8, 8, 16>}]} {
    %c8_i32 = arith.constant 8 : i32
    %0 = arith.muli %arg1, %c8_i32 : i32
    %cst = arith.constant 0.000000e+00 : f32
    %1 = vector.broadcast %cst : f32 to vector<8x8x16xf32>
    %c0_i32 = arith.constant 0 : i32
    %2 = arith.addi %0, %c0_i32 : i32
    %c0 = arith.constant 0 : index
    %3 = arith.index_cast %2 : i32 to index
    %c0_0 = arith.constant 0 : index
    %c0_1 = arith.constant 0 : index
    %4 = vector.load %arg2[%c0, %3, %c0_0, %c0_1] : memref<1x18x4x18xbf16, #tpu.memory_space<vmem>>, vector<1x8x4x16xbf16>
    %5 = vector.shape_cast %4 : vector<1x8x4x16xbf16> to vector<8x4x16xbf16>
    %c0_2 = arith.constant 0 : index
    %c0_3 = arith.constant 0 : index
    %c0_4 = arith.constant 0 : index
    %6 = vector.load %arg3[%c0_2, %c0_3, %c0_4] : memref<9x8x4xbf16, #tpu.memory_space<vmem>>, vector<1x8x4xbf16>
    %7 = vector.shape_cast %6 : vector<1x8x4xbf16> to vector<8x4xbf16>
    %8 = vector.shape_cast %7 : vector<8x4xbf16> to vector<1x8x4xbf16>
    %9 = vector.shape_cast %8 : vector<1x8x4xbf16> to vector<1x8x4xbf16>
    %10 = vector.broadcast %9 : vector<1x8x4xbf16> to vector<8x8x4xbf16>
    "tpu.trace_start"() <{level = 10 : i32, message = "toc,tcw->tow"}> : () -> ()
    %cst_5 = arith.constant dense<0.000000e+00> : vector<8x8x16xf32>
    %11 = tpu.matmul %10, %5, %cst_5 {dimension_numbers = #tpu.dot_dimension_numbers<[2], [1], [1], [2], [0, 0, 0, 1, 1, 2], [0], [0]>} : vector<8x8x4xbf16>, vector<8x4x16xbf16>, vector<8x8x16xf32> -> vector<8x8x16xf32>
    "tpu.trace_stop"() : () -> ()
    %12 = arith.addf %1, %11 : vector<8x8x16xf32>
    %c0_i32_6 = arith.constant 0 : i32
    %13 = arith.addi %0, %c0_i32_6 : i32
    %c0_7 = arith.constant 0 : index
    %14 = arith.index_cast %13 : i32 to index
    %c0_8 = arith.constant 0 : index
    %c1 = arith.constant 1 : index
    %15 = vector.load %arg2[%c0_7, %14, %c0_8, %c1] : memref<1x18x4x18xbf16, #tpu.memory_space<vmem>>, vector<1x8x4x16xbf16>
    %16 = vector.shape_cast %15 : vector<1x8x4x16xbf16> to vector<8x4x16xbf16>
    %c1_9 = arith.constant 1 : index
    %c0_10 = arith.constant 0 : index
    %c0_11 = arith.constant 0 : index
    %17 = vector.load %arg3[%c1_9, %c0_10, %c0_11] : memref<9x8x4xbf16, #tpu.memory_space<vmem>>, vector<1x8x4xbf16>
    %18 = vector.shape_cast %17 : vector<1x8x4xbf16> to vector<8x4xbf16>
    %19 = vector.shape_cast %18 : vector<8x4xbf16> to vector<1x8x4xbf16>
    %20 = vector.shape_cast %19 : vector<1x8x4xbf16> to vector<1x8x4xbf16>
    %21 = vector.broadcast %20 : vector<1x8x4xbf16> to vector<8x8x4xbf16>
    "tpu.trace_start"() <{level = 10 : i32, message = "toc,tcw->tow"}> : () -> ()
    %cst_12 = arith.constant dense<0.000000e+00> : vector<8x8x16xf32>
    %22 = tpu.matmul %21, %16, %cst_12 {dimension_numbers = #tpu.dot_dimension_numbers<[2], [1], [1], [2], [0, 0, 0, 1, 1, 2], [0], [0]>} : vector<8x8x4xbf16>, vector<8x4x16xbf16>, vector<8x8x16xf32> -> vector<8x8x16xf32>
    "tpu.trace_stop"() : () -> ()
    %23 = arith.addf %12, %22 : vector<8x8x16xf32>
    %c0_i32_13 = arith.constant 0 : i32
    %24 = arith.addi %0, %c0_i32_13 : i32
    %c0_14 = arith.constant 0 : index
    %25 = arith.index_cast %24 : i32 to index
    %c0_15 = arith.constant 0 : index
    %c2 = arith.constant 2 : index
    %26 = vector.load %arg2[%c0_14, %25, %c0_15, %c2] : memref<1x18x4x18xbf16, #tpu.memory_space<vmem>>, vector<1x8x4x16xbf16>
    %27 = vector.shape_cast %26 : vector<1x8x4x16xbf16> to vector<8x4x16xbf16>
    %c2_16 = arith.constant 2 : index
    %c0_17 = arith.constant 0 : index
    %c0_18 = arith.constant 0 : index
    %28 = vector.load %arg3[%c2_16, %c0_17, %c0_18] : memref<9x8x4xbf16, #tpu.memory_space<vmem>>, vector<1x8x4xbf16>
    %29 = vector.shape_cast %28 : vector<1x8x4xbf16> to vector<8x4xbf16>
    %30 = vector.shape_cast %29 : vector<8x4xbf16> to vector<1x8x4xbf16>
    %31 = vector.shape_cast %30 : vector<1x8x4xbf16> to vector<1x8x4xbf16>
    %32 = vector.broadcast %31 : vector<1x8x4xbf16> to vector<8x8x4xbf16>
    "tpu.trace_start"() <{level = 10 : i32, message = "toc,tcw->tow"}> : () -> ()
    %cst_19 = arith.constant dense<0.000000e+00> : vector<8x8x16xf32>
    %33 = tpu.matmul %32, %27, %cst_19 {dimension_numbers = #tpu.dot_dimension_numbers<[2], [1], [1], [2], [0, 0, 0, 1, 1, 2], [0], [0]>} : vector<8x8x4xbf16>, vector<8x4x16xbf16>, vector<8x8x16xf32> -> vector<8x8x16xf32>
    "tpu.trace_stop"() : () -> ()
    %34 = arith.addf %23, %33 : vector<8x8x16xf32>
    %c1_i32 = arith.constant 1 : i32
    %35 = arith.addi %0, %c1_i32 : i32
    %c0_20 = arith.constant 0 : index
    %36 = arith.index_cast %35 : i32 to index
    %c0_21 = arith.constant 0 : index
    %c0_22 = arith.constant 0 : index
    %37 = vector.load %arg2[%c0_20, %36, %c0_21, %c0_22] : memref<1x18x4x18xbf16, #tpu.memory_space<vmem>>, vector<1x8x4x16xbf16>
    %38 = vector.shape_cast %37 : vector<1x8x4x16xbf16> to vector<8x4x16xbf16>
    %c3 = arith.constant 3 : index
    %c0_23 = arith.constant 0 : index
    %c0_24 = arith.constant 0 : index
    %39 = vector.load %arg3[%c3, %c0_23, %c0_24] : memref<9x8x4xbf16, #tpu.memory_space<vmem>>, vector<1x8x4xbf16>
    %40 = vector.shape_cast %39 : vector<1x8x4xbf16> to vector<8x4xbf16>
    %41 = vector.shape_cast %40 : vector<8x4xbf16> to vector<1x8x4xbf16>
    %42 = vector.shape_cast %41 : vector<1x8x4xbf16> to vector<1x8x4xbf16>
    %43 = vector.broadcast %42 : vector<1x8x4xbf16> to vector<8x8x4xbf16>
    "tpu.trace_start"() <{level = 10 : i32, message = "toc,tcw->tow"}> : () -> ()
    %cst_25 = arith.constant dense<0.000000e+00> : vector<8x8x16xf32>
    %44 = tpu.matmul %43, %38, %cst_25 {dimension_numbers = #tpu.dot_dimension_numbers<[2], [1], [1], [2], [0, 0, 0, 1, 1, 2], [0], [0]>} : vector<8x8x4xbf16>, vector<8x4x16xbf16>, vector<8x8x16xf32> -> vector<8x8x16xf32>
    "tpu.trace_stop"() : () -> ()
    %45 = arith.addf %34, %44 : vector<8x8x16xf32>
    %c1_i32_26 = arith.constant 1 : i32
    %46 = arith.addi %0, %c1_i32_26 : i32
    %c0_27 = arith.constant 0 : index
    %47 = arith.index_cast %46 : i32 to index
    %c0_28 = arith.constant 0 : index
    %c1_29 = arith.constant 1 : index
    %48 = vector.load %arg2[%c0_27, %47, %c0_28, %c1_29] : memref<1x18x4x18xbf16, #tpu.memory_space<vmem>>, vector<1x8x4x16xbf16>
    %49 = vector.shape_cast %48 : vector<1x8x4x16xbf16> to vector<8x4x16xbf16>
    %c4 = arith.constant 4 : index
    %c0_30 = arith.constant 0 : index
    %c0_31 = arith.constant 0 : index
    %50 = vector.load %arg3[%c4, %c0_30, %c0_31] : memref<9x8x4xbf16, #tpu.memory_space<vmem>>, vector<1x8x4xbf16>
    %51 = vector.shape_cast %50 : vector<1x8x4xbf16> to vector<8x4xbf16>
    %52 = vector.shape_cast %51 : vector<8x4xbf16> to vector<1x8x4xbf16>
    %53 = vector.shape_cast %52 : vector<1x8x4xbf16> to vector<1x8x4xbf16>
    %54 = vector.broadcast %53 : vector<1x8x4xbf16> to vector<8x8x4xbf16>
    "tpu.trace_start"() <{level = 10 : i32, message = "toc,tcw->tow"}> : () -> ()
    %cst_32 = arith.constant dense<0.000000e+00> : vector<8x8x16xf32>
    %55 = tpu.matmul %54, %49, %cst_32 {dimension_numbers = #tpu.dot_dimension_numbers<[2], [1], [1], [2], [0, 0, 0, 1, 1, 2], [0], [0]>} : vector<8x8x4xbf16>, vector<8x4x16xbf16>, vector<8x8x16xf32> -> vector<8x8x16xf32>
    "tpu.trace_stop"() : () -> ()
    %56 = arith.addf %45, %55 : vector<8x8x16xf32>
    %c1_i32_33 = arith.constant 1 : i32
    %57 = arith.addi %0, %c1_i32_33 : i32
    %c0_34 = arith.constant 0 : index
    %58 = arith.index_cast %57 : i32 to index
    %c0_35 = arith.constant 0 : index
    %c2_36 = arith.constant 2 : index
    %59 = vector.load %arg2[%c0_34, %58, %c0_35, %c2_36] : memref<1x18x4x18xbf16, #tpu.memory_space<vmem>>, vector<1x8x4x16xbf16>
    %60 = vector.shape_cast %59 : vector<1x8x4x16xbf16> to vector<8x4x16xbf16>
    %c5 = arith.constant 5 : index
    %c0_37 = arith.constant 0 : index
    %c0_38 = arith.constant 0 : index
    %61 = vector.load %arg3[%c5, %c0_37, %c0_38] : memref<9x8x4xbf16, #tpu.memory_space<vmem>>, vector<1x8x4xbf16>
    %62 = vector.shape_cast %61 : vector<1x8x4xbf16> to vector<8x4xbf16>
    %63 = vector.shape_cast %62 : vector<8x4xbf16> to vector<1x8x4xbf16>
    %64 = vector.shape_cast %63 : vector<1x8x4xbf16> to vector<1x8x4xbf16>
    %65 = vector.broadcast %64 : vector<1x8x4xbf16> to vector<8x8x4xbf16>
    "tpu.trace_start"() <{level = 10 : i32, message = "toc,tcw->tow"}> : () -> ()
    %cst_39 = arith.constant dense<0.000000e+00> : vector<8x8x16xf32>
    %66 = tpu.matmul %65, %60, %cst_39 {dimension_numbers = #tpu.dot_dimension_numbers<[2], [1], [1], [2], [0, 0, 0, 1, 1, 2], [0], [0]>} : vector<8x8x4xbf16>, vector<8x4x16xbf16>, vector<8x8x16xf32> -> vector<8x8x16xf32>
    "tpu.trace_stop"() : () -> ()
    %67 = arith.addf %56, %66 : vector<8x8x16xf32>
    %c2_i32 = arith.constant 2 : i32
    %68 = arith.addi %0, %c2_i32 : i32
    %c0_40 = arith.constant 0 : index
    %69 = arith.index_cast %68 : i32 to index
    %c0_41 = arith.constant 0 : index
    %c0_42 = arith.constant 0 : index
    %70 = vector.load %arg2[%c0_40, %69, %c0_41, %c0_42] : memref<1x18x4x18xbf16, #tpu.memory_space<vmem>>, vector<1x8x4x16xbf16>
    %71 = vector.shape_cast %70 : vector<1x8x4x16xbf16> to vector<8x4x16xbf16>
    %c6 = arith.constant 6 : index
    %c0_43 = arith.constant 0 : index
    %c0_44 = arith.constant 0 : index
    %72 = vector.load %arg3[%c6, %c0_43, %c0_44] : memref<9x8x4xbf16, #tpu.memory_space<vmem>>, vector<1x8x4xbf16>
    %73 = vector.shape_cast %72 : vector<1x8x4xbf16> to vector<8x4xbf16>
    %74 = vector.shape_cast %73 : vector<8x4xbf16> to vector<1x8x4xbf16>
    %75 = vector.shape_cast %74 : vector<1x8x4xbf16> to vector<1x8x4xbf16>
    %76 = vector.broadcast %75 : vector<1x8x4xbf16> to vector<8x8x4xbf16>
    "tpu.trace_start"() <{level = 10 : i32, message = "toc,tcw->tow"}> : () -> ()
    %cst_45 = arith.constant dense<0.000000e+00> : vector<8x8x16xf32>
    %77 = tpu.matmul %76, %71, %cst_45 {dimension_numbers = #tpu.dot_dimension_numbers<[2], [1], [1], [2], [0, 0, 0, 1, 1, 2], [0], [0]>} : vector<8x8x4xbf16>, vector<8x4x16xbf16>, vector<8x8x16xf32> -> vector<8x8x16xf32>
    "tpu.trace_stop"() : () -> ()
    %78 = arith.addf %67, %77 : vector<8x8x16xf32>
    %c2_i32_46 = arith.constant 2 : i32
    %79 = arith.addi %0, %c2_i32_46 : i32
    %c0_47 = arith.constant 0 : index
    %80 = arith.index_cast %79 : i32 to index
    %c0_48 = arith.constant 0 : index
    %c1_49 = arith.constant 1 : index
    %81 = vector.load %arg2[%c0_47, %80, %c0_48, %c1_49] : memref<1x18x4x18xbf16, #tpu.memory_space<vmem>>, vector<1x8x4x16xbf16>
    %82 = vector.shape_cast %81 : vector<1x8x4x16xbf16> to vector<8x4x16xbf16>
    %c7 = arith.constant 7 : index
    %c0_50 = arith.constant 0 : index
    %c0_51 = arith.constant 0 : index
    %83 = vector.load %arg3[%c7, %c0_50, %c0_51] : memref<9x8x4xbf16, #tpu.memory_space<vmem>>, vector<1x8x4xbf16>
    %84 = vector.shape_cast %83 : vector<1x8x4xbf16> to vector<8x4xbf16>
    %85 = vector.shape_cast %84 : vector<8x4xbf16> to vector<1x8x4xbf16>
    %86 = vector.shape_cast %85 : vector<1x8x4xbf16> to vector<1x8x4xbf16>
    %87 = vector.broadcast %86 : vector<1x8x4xbf16> to vector<8x8x4xbf16>
    "tpu.trace_start"() <{level = 10 : i32, message = "toc,tcw->tow"}> : () -> ()
    %cst_52 = arith.constant dense<0.000000e+00> : vector<8x8x16xf32>
    %88 = tpu.matmul %87, %82, %cst_52 {dimension_numbers = #tpu.dot_dimension_numbers<[2], [1], [1], [2], [0, 0, 0, 1, 1, 2], [0], [0]>} : vector<8x8x4xbf16>, vector<8x4x16xbf16>, vector<8x8x16xf32> -> vector<8x8x16xf32>
    "tpu.trace_stop"() : () -> ()
    %89 = arith.addf %78, %88 : vector<8x8x16xf32>
    %c2_i32_53 = arith.constant 2 : i32
    %90 = arith.addi %0, %c2_i32_53 : i32
    %c0_54 = arith.constant 0 : index
    %91 = arith.index_cast %90 : i32 to index
    %c0_55 = arith.constant 0 : index
    %c2_56 = arith.constant 2 : index
    %92 = vector.load %arg2[%c0_54, %91, %c0_55, %c2_56] : memref<1x18x4x18xbf16, #tpu.memory_space<vmem>>, vector<1x8x4x16xbf16>
    %93 = vector.shape_cast %92 : vector<1x8x4x16xbf16> to vector<8x4x16xbf16>
    %c8 = arith.constant 8 : index
    %c0_57 = arith.constant 0 : index
    %c0_58 = arith.constant 0 : index
    %94 = vector.load %arg3[%c8, %c0_57, %c0_58] : memref<9x8x4xbf16, #tpu.memory_space<vmem>>, vector<1x8x4xbf16>
    %95 = vector.shape_cast %94 : vector<1x8x4xbf16> to vector<8x4xbf16>
    %96 = vector.shape_cast %95 : vector<8x4xbf16> to vector<1x8x4xbf16>
    %97 = vector.shape_cast %96 : vector<1x8x4xbf16> to vector<1x8x4xbf16>
    %98 = vector.broadcast %97 : vector<1x8x4xbf16> to vector<8x8x4xbf16>
    "tpu.trace_start"() <{level = 10 : i32, message = "toc,tcw->tow"}> : () -> ()
    %cst_59 = arith.constant dense<0.000000e+00> : vector<8x8x16xf32>
    %99 = tpu.matmul %98, %93, %cst_59 {dimension_numbers = #tpu.dot_dimension_numbers<[2], [1], [1], [2], [0, 0, 0, 1, 1, 2], [0], [0]>} : vector<8x8x4xbf16>, vector<8x4x16xbf16>, vector<8x8x16xf32> -> vector<8x8x16xf32>
    "tpu.trace_stop"() : () -> ()
    %100 = arith.addf %89, %99 : vector<8x8x16xf32>
    %c0_60 = arith.constant 0 : index
    %c0_61 = arith.constant 0 : index
    %101 = vector.load %arg4[%c0_60, %c0_61] : memref<8x1xf32, #tpu.memory_space<vmem>>, vector<8x1xf32>
    %102 = vector.shape_cast %101 : vector<8x1xf32> to vector<1x8x1xf32>
    %103 = vector.broadcast %102 : vector<1x8x1xf32> to vector<8x8x16xf32>
    %104 = arith.addf %100, %103 : vector<8x8x16xf32>
    %cst_62 = arith.constant 0.00999999977 : f32
    %105 = vector.broadcast %cst_62 : f32 to vector<8x8x16xf32>
    %106 = arith.mulf %105, %104 : vector<8x8x16xf32>
    %107 = arith.maximumf %104, %106 : vector<8x8x16xf32>
    %c0_63 = arith.constant 0 : index
    %c0_64 = arith.constant 0 : index
    %c0_65 = arith.constant 0 : index
    %c0_66 = arith.constant 0 : index
    %108 = vector.load %arg5[%c0_63, %c0_64, %c0_65, %c0_66] : memref<1x8x8x16xf32, #tpu.memory_space<vmem>>, vector<1x8x8x16xf32>
    %109 = vector.shape_cast %108 : vector<1x8x8x16xf32> to vector<8x8x16xf32>
    %110 = vector.shape_cast %107 : vector<8x8x16xf32> to vector<1x8x8x16xf32>
    tpu.vector_store %arg5[%c0_63, %c0_64, %c0_65, %c0_66], %110 {strides = array<i32>} : memref<1x8x8x16xf32, #tpu.memory_space<vmem>>, vector<1x8x8x16xf32>,
    return
  }
  func.func @transform_0(%arg0: i32, %arg1: i32) -> (i32, i32, i32, i32) {
    %c0_i32 = arith.constant 0 : i32
    %c0_i32_0 = arith.constant 0 : i32
    %c0_i32_1 = arith.constant 0 : i32
    %c0_i32_2 = arith.constant 0 : i32
    return %arg0, %c0_i32, %c0_i32_0, %c0_i32_1 : i32, i32, i32, i32
  }
  func.func @transform_1(%arg0: i32, %arg1: i32) -> (i32, i32, i32) {
    %c0_i32 = arith.constant 0 : i32
    %c0_i32_0 = arith.constant 0 : i32
    %c0_i32_1 = arith.constant 0 : i32
    %c0_i32_2 = arith.constant 0 : i32
    return %c0_i32, %c0_i32_0, %c0_i32_1 : i32, i32, i32
  }
  func.func @transform_2(%arg0: i32, %arg1: i32) -> (i32, i32) {
    %c0_i32 = arith.constant 0 : i32
    %c0_i32_0 = arith.constant 0 : i32
    %c0_i32_1 = arith.constant 0 : i32
    return %c0_i32, %c0_i32_0 : i32, i32
  }
  func.func @transform_3(%arg0: i32, %arg1: i32) -> (i32, i32, i32, i32) {
    %c0_i32 = arith.constant 0 : i32
    %c0_i32_0 = arith.constant 0 : i32
    %c0_i32_1 = arith.constant 0 : i32
    return %arg0, %arg1, %c0_i32, %c0_i32_0 : i32, i32, i32, i32
  }
}

</mosaic_0001>

<bundles_post_ra>
// kernel: tpu_custom_call.1
= control target key start
LH: loop header
LB: loop body
LE: loop exit
PB: predicated region body
PF: predicated region fallthrough
CT: control target
= control target key end

     0   :  { %8 = vsyncpa [#allocation3], 0  ;;  %s3038_s0 = inlined_call_operand.hbm [shape: bf16[2,18,4,18], index: 0, kind: input, shape index: {}]   ;;  %s3039_s1 = inlined_call_operand.vmem [shape: bf16[9,8,4], index: 1, kind: input, shape index: {}]   ;;  %s3040_s2 = inlined_call_operand.vmem [shape: f32[8,1], index: 2, kind: input, shape index: {}]   ;;  %s3041_s3 = inlined_call_operand.hbm [shape: f32[2,16,8,16], index: 3, kind: output, shape index: {}]  }
   0x1   :  { %10 = vsyncpa [#allocation3 + $0x1], 0 }
   0x2   :  { %11 = vsyncpa [#allocation4], 0 }
   0x3   :  { %13 = vsyncpa [#allocation4 + $0x1], 0  ;;  %s2428_s12 = smov 0   ;;  %s2430_s13 = smov 0  }
   0x4   :  { %s2432_s14 = smov 0   ;;  %s2434_s15 = smov 0  }
   0x5   :  { %s2436_s16 = smov 0   ;;  %s2438_s17 = smov 0  }
   0x6   :  { %s2440_s18 = smov 0   ;;  %s2442_s19 = smov 0  }
   0x7   :  { %s2444_s20 = smov 0   ;;  %s2446_s21 = smov 0  }
   0x8   :  { %s2448_s22 = smov 0  }
   0x9 LB: > { %3046 = sst [smem:[#allocation8_spill]] %s2391_s20  ;;  %s1984_s23 = sadd.s32 4294967295, %s2399_s22   ;;  %s2399_s22 = sphi %s2448_s22, %s19_s22   ;;  %s2395_s21 = sphi %s2446_s21, %s3059_s21   ;;  %s2391_s20 = sphi %s2444_s20, %s3058_s20   ;;  %s2387_s19 = sphi %s2442_s19, %s3057_s19   ;;  %s2383_s18 = sphi %s2440_s18, %s3056_s18   ;;  %s2379_s17 = sphi %s2438_s17, %s3065_s17   ;;  %s2375_s16 = sphi %s2436_s16, %s3064_s16   ;;  %s2371_s15 = sphi %s2434_s15, %s3063_s15   ;;  %s2367_s14 = sphi %s2432_s14, %s3062_s14   ;;  %s2363_s13 = sphi %s2430_s13, %s3061_s13   ;;  %s2359_s12 = sphi %s2428_s12, %s3060_s12  }
   0xa   : > { %3047 = sst [smem:[#allocation9_spill]] %s2395_s21  ;;  %s1985_s24 = sadd.s32 4294967294, %s2399_s22  }
   0xb   : > { %s28_s25 = sadd.s32 1, %s2391_s20  ;;  %s31_s26 = sadd.s32 1, %s2395_s21 }
   0xc   : > { %p29_p0 = scmp.ge.s32.totalorder %s28_s25, 2  ;;  %s38_s27 = sadd.s32 1, %s2379_s17 }
   0xd   : > { %p45_p1 = scmp.ne.s32.totalorder %s2379_s17, %s2375_s16  ;;  %p46_p2 = scmp.eq.s32.totalorder %s2399_s22, 0 }
   0xe   : > { %s3067_s25 = smov (%p29_p0, %s28_s25), 0  ;;  %s3069_s26 = smov (!%p29_p0, %s31_s26), %s2395_s21 }
   0xf   : > { %3048 = sst [smem:[#allocation10_spill]] %s3067_s25  ;;  %p2492_p3 = por %p46_p2, %p45_p1 }
  0x10   : > { %p51_p4 = scmp.ne.s32.totalorder %s2375_s16, %s2371_s15  ;;  %p33_p5 = scmp.ge.s32.totalorder %s3069_s26, 2 }
  0x11   : > { %p52_p6 = scmp.eq.s32.totalorder %s1984_s23, 0  ;;  %s104_s29 = ssub.s32 %s2391_s20, %s3067_s25 }
  0x12   : > { %s108_s30 = sadd.s32 1, %s2367_s14  ;;  %s3071_s26 = smov (%p33_p5, %s3069_s26), 0 }
  0x13   : > { %3050 = sst [smem:[#allocation11_spill]] %s3071_s26  ;;  %p2502_p7 = por %p52_p6, %p51_p4 }
  0x14   : > { %p118_p8 = scmp.ne.s32.totalorder %s2367_s14, %s2363_s13  ;;  %s35_s5 = ssub.s32 %s2395_s21, %s3071_s26 }
  0x15   : > { %p119_p9 = scmp.eq.s32.totalorder %s1984_s23, 3  ;;  %p36_p10 = scmp.eq.s32.totalorder %s35_s5, 0 }
  0x16   : > { %s105_s6 = sor.u32 %s104_s29, %s35_s5  ;;  %p124_p13 = scmp.ne.s32.totalorder %s2363_s13, %s2359_s12 }
  0x17   : > { %p106_p11 = scmp.eq.s32.totalorder %s105_s6, 0  ;;  %p2510_p12 = por %p119_p9, %p118_p8 }
  0x18   : > { %s2515_s8 = scalar_select %p36_p10, %s2379_s17, %s38_s27  }
  0x19   : > { %s2518_s9 = scalar_select %p106_p11, %s2367_s14, %s108_s30  }
  0x1a   : > { %3053 = sst [smem:[#allocation12_spill]] %s2515_s8  ;;  %p125_p0 = scmp.eq.s32.totalorder %s1985_s24, 3 }
  0x1b   : > { %p2149_p1 = scmp.lt.s32.totalorder %s2399_s22, 4  ;;  %s151_s11 = sand.u32 1, %s2379_s17  }
  0x1c   : > { %p2523_p2 = por %p125_p0, %p124_p13  ;;  %s2134_s15 = smul.u32 36, %s151_s11 }
  0x1d   : > { %s2135_s23 = smul.u32 36, %s2395_s21  ;;  %p2142_p4 = pnand %p2149_p1, %p2492_p3 }
  0x1e   : > { %s155_s6 = scalar_lea.vmem [#allocation2], %s2134_s15  ;;  %p1989_p5 = scmp.ge.s32.totalorder %s2399_s22, 1 }
  0x1f   : > { %s160_s27 = scalar_lea.hbm %s3038_s0, %s2135_s23  ;;  %s163_s30 = sshll.u32 %s155_s6, 4  ;;  %s164_s30 = int_to_ptr.vmem [resolvable:$true] %s163_s30 }
  0x20   : > { %s161_s26 = sshll.u32 %s160_s27, 4  ;;  %s152_s24 = scalar_lea.sflag [#allocation3], %s151_s11  ;;  %s162_s26 = int_to_ptr.hbm [resolvable:$true] %s161_s26 }
  0x21   : > { %s2401_s25 = smov 32   ;;  %s2402_s20 = smov 2  }
  0x22   : > { %2144 = dma.hbm_to_vmem [thread:$0]  (!%p2142_p4), %s162_s26, 576, %s164_s30, %s152_s24, %s2401_s25, %s2401_s25, %s2402_s20  }
  0x23   : > { %p171_p6 = scmp.lt.s32.totalorder %s2399_s22, 5 }
  0x25   : > { %p172_p8 = pnand %p1989_p5, %p171_p6 }
  0x26   : > { %s177_s28 = sand.u32 (!%p172_p8), 1, %s2375_s16  }
  0x27   : > { %175 = sbr.rel (%p172_p8) target bundleno = 695 (0x2b7), region = 32  ;;  %s178_s8 = scalar_lea.sflag (!%p172_p8), [#allocation3], %s177_s28 }
  0x28   : > { %s2136_s21 = smul.u32 (!%p172_p8), 36, %s177_s28 }
  0x2a   : > { %s181_s29 = scalar_lea.vmem (!%p172_p8), [#allocation2], %s2136_s21 }
  0x2c   : > { %2350 = dma.done.wait (%p2502_p7), %s178_s8, 576  }
  0x2d   : > { %2352 = vsyncadd (%p2502_p7), %s178_s8, 4294966720  ;;  %s2131_s15 = sshll.u32 %s2383_s18, 4  ;;  %s2403_s20 = smov 127   ;;  %vm239_vm0 = vcmask 1041408   ;;  %v2578_v33 = vld [vmem:[%s3039_s1 + $0x4] sm:$0xf] }
  0x2e   : > { %s2542_s11 = scalar_lea.vmem %s181_s29, %s2131_s15 [#allocation2]  ;;  %s2404_s21 = smov 126   ;;  %vm235_vm1 = vcmask 31744   ;;  %vm1860_vm2 = vcmask 130048  }
  0x2f   : > { %v219_v0 = vld [vmem:[%s2542_s11] sm:$0x3]  ;;  %v220_v1 = vld [vmem:[%s2542_s11 + $0x2] sm:$0x3]  ;;  %v221_v3 = vld [vmem:[%s2542_s11 + $0x4] sm:$0x3] }
  0x30   : > { %230 = vst [vmem:[#allocation1] ss:$4 sm:$0xff] %v219_v0  ;;  %v222_v5 = vld [vmem:[%s2542_s11 + $0x6] sm:$0x3]  ;;  %v223_v7 = vld [vmem:[%s2542_s11 + $0x8] sm:$0x3] }
  0x31   : > { %v224_v9 = vld [vmem:[%s2542_s11 + $0xa] sm:$0x3]  ;;  %v225_v11 = vld [vmem:[%s2542_s11 + $0xc] sm:$0x3]  ;;  %v226_v13 = vld [vmem:[%s2542_s11 + $0xe] sm:$0x3] }
  0x32   : > { %v541_v15 = vld [vmem:[%s2542_s11] sm:$0x3]  ;;  %v542_v17 = vld [vmem:[%s2542_s11 + $0x2] sm:$0x3]  ;;  %v543_v19 = vld [vmem:[%s2542_s11 + $0x4] sm:$0x3] }
  0x33   : > { %v544_v21 = vld [vmem:[%s2542_s11 + $0x6] sm:$0x3]  ;;  %v545_v23 = vld [vmem:[%s2542_s11 + $0x8] sm:$0x3]  ;;  %v546_v25 = vld [vmem:[%s2542_s11 + $0xa] sm:$0x3] }
  0x34   : > { %v547_v27 = vld [vmem:[%s2542_s11 + $0xc] sm:$0x3]  ;;  %v548_v29 = vld [vmem:[%s2542_s11 + $0xe] sm:$0x3]  ;;  %v2038_v34 = vld [vmem:[%s2542_s11 + $0x2] sm:$0x3] }
  0x35   : > { %v2039_v38 = vld [vmem:[%s2542_s11 + $0x4] sm:$0x3]  ;;  %v2040_v42 = vld [vmem:[%s2542_s11 + $0x6] sm:$0x3]  ;;  %v2041_v50 = vld [vmem:[%s2542_s11 + $0x8] sm:$0x3] }
  0x36   : > { %v212_v44 = vld [vmem:[%s2542_s11 + $0x4] sm:$0x3]  ;;  %v210_v52 = vld [vmem:[%s2542_s11] sm:$0x3]  ;;  %v214_v58 = vld [vmem:[%s2542_s11 + $0x8] sm:$0x3] }
  0x37   : > { %v231_v2 = vld.sshfl [vmem:[#allocation1] sm:$0xff pattern:$0x73625140]  ;;  %v446_v47 = vsel %vm239_vm0, %v212_v44, 0  ;;  %v414_v54 = vsel %vm239_vm0, %v210_v52, 0  ;;  %v478_v60 = vsel %vm239_vm0, %v214_v58, 0 }
  0x38   : > { %233 = vrot.lane.b32.xlu1 %v231_v2, %s2403_s20  ;;  %257 = vst [vmem:[#allocation1] ss:$4 sm:$0xff] %v220_v1  ;;  %v2042_v59 = vld [vmem:[%s2542_s11 + $0xa] sm:$0x3]  ;;  %v211_v62 = vld [vmem:[%s2542_s11 + $0x2] sm:$0x3] }
  0x39   : > { %v213_v63 = vld [vmem:[%s2542_s11 + $0x6] sm:$0x3]  ;;  %v216_v1 = vld [vmem:[%s2542_s11 + $0xc] sm:$0x3]  ;;  %v2022_v52 = vld [vmem:[%s2542_s11 + $0x4] sm:$0x3] }
  0x3a   : > { %v462_v0 = vsel %vm239_vm0, %v213_v63, 0  ;;  %v2023_v44 = vld [vmem:[%s2542_s11 + $0x6] sm:$0x3]  ;;  %v2062_v63 = vld [vmem:[%s2542_s11 + $0x10] sm:$0x3]  ;;  %s202_s23 = sand.u32 1, %s2363_s13  }
  0x3b   : > { %s1990_s5 = sshll.u32 %s202_s23, 6  ;;  %s2126_s6 = sshll.u32 %s2383_s18, 3 }
  0x3c   : > { %s2955_s27 = scalar_lea.vmem [#allocation5], %s1990_s5  ;;  %s2127_s30 = sshll.u32 %s2387_s19, 4 }
  0x3d   : > { %s1881_s24 = sadd.s32 %s2127_s30, %s2126_s6  ;;  %s1870_s18 = scalar_lea.sflag [#allocation4], %s202_s23 }
  0x3e   : > { %s2128_s28 = sshll.u32 %s1881_s24, 3  ;;  %s2297_s8 = scalar_lea.hbm %s3041_s3, 256 }
  0x3f   : > { %v258_v4 = vld.sshfl [vmem:[#allocation1] sm:$0xff pattern:$0x73625140] }
  0x40   : > { %279 = vst [vmem:[#allocation1] ss:$4 sm:$0xff] %v221_v3  ;;  %260 = vrot.lane.b32.xlu1 %v258_v4, %s2403_s20  ;;  %v430_v3 = vsel %vm239_vm0, %v211_v62, 0  ;;  %v510_v4 = vsel %vm239_vm0, %v216_v1, 0  ;;  %v2028_v62 = vld [vmem:[%s2542_s11 + $0x10] sm:$0x3] }
  0x41   : > { %v867_v1 = vsel %vm239_vm0, %v2028_v62, 0 }
  0x47   : > { %v280_v6 = vld.sshfl [vmem:[#allocation1] sm:$0xff pattern:$0x73625140] }
  0x48   : > { %282 = vrot.lane.b32.xlu0 %v280_v6, %s2403_s20  ;;  %301 = vst [vmem:[#allocation1] ss:$4 sm:$0xff] %v222_v5  ;;  %v2043_v6 = vld [vmem:[%s2542_s11 + $0xc] sm:$0x3] }
  0x4f   : > { %v302_v8 = vld.sshfl [vmem:[#allocation1] sm:$0xff pattern:$0x73625140] }
  0x50   : > { %304 = vrot.lane.b32.xlu0 %v302_v8, %s2403_s20  ;;  %323 = vst [vmem:[#allocation1] ss:$4 sm:$0xff] %v223_v7  ;;  %v218_v8 = vld [vmem:[%s3039_s1] sm:$0xf] }
  0x57   : > { %v324_v10 = vld.sshfl [vmem:[#allocation1] sm:$0xff pattern:$0x73625140] }
  0x58   : > { %326 = vrot.lane.b32.xlu0 %v324_v10, %s2403_s20  ;;  %345 = vst [vmem:[#allocation1] ss:$4 sm:$0xff] %v224_v9  ;;  %v2044_v9 = vld [vmem:[%s2542_s11 + $0xe] sm:$0x3] }
  0x5f   : > { %v346_v12 = vld.sshfl [vmem:[#allocation1] sm:$0xff pattern:$0x73625140] }
  0x60   : > { %348 = vrot.lane.b32.xlu1 %v346_v12, %s2403_s20  ;;  %367 = vst [vmem:[#allocation1] ss:$4 sm:$0xff] %v225_v11  ;;  %v215_v11 = vld [vmem:[%s2542_s11 + $0xa] sm:$0x3] }
  0x61   : > { %v494_v12 = vsel %vm239_vm0, %v215_v11, 0 }
  0x67   : > { %v368_v14 = vld.sshfl [vmem:[#allocation1] sm:$0xff pattern:$0x73625140] }
  0x68   : > { %370 = vrot.lane.b32.xlu2 %v368_v14, %s2403_s20  ;;  %389 = vst [vmem:[#allocation1] ss:$4 sm:$0xff] %v226_v13  ;;  %v217_v13 = vld [vmem:[%s2542_s11 + $0xe] sm:$0x3] }
  0x69   : > { %v526_v14 = vsel %vm239_vm0, %v217_v13, 0 }
  0x6f   : > { %v390_v16 = vld.sshfl [vmem:[#allocation1] sm:$0xff pattern:$0x73625140] }
  0x70   : > { %392 = vrot.lane.b32.xlu2 %v390_v16, %s2403_s20  ;;  %552 = vst [vmem:[#allocation1] ss:$4 sm:$0xff] %v541_v15 }
  0x77   : > { %v553_v18 = vld.sshfl [vmem:[#allocation1] sm:$0xff pattern:$0x73625140] }
  0x78   : > { %555 = vrot.lane.b32.xlu1 %v553_v18, %s2404_s21  ;;  %577 = vst [vmem:[#allocation1] ss:$4 sm:$0xff] %v542_v17  ;;  %v2045_v17 = vld [vmem:[%s2542_s11 + $0x10] sm:$0x3] }
  0x7f   : > { %v578_v20 = vld.sshfl [vmem:[#allocation1] sm:$0xff pattern:$0x73625140] }
  0x80   : > { %599 = vst [vmem:[#allocation1] ss:$4 sm:$0xff] %v543_v19 }
  0x87   : > { %v600_v22 = vld.sshfl [vmem:[#allocation1] sm:$0xff pattern:$0x73625140] }
  0x88   : > { %602 = vrot.lane.b32.xlu2 %v600_v22, %s2404_s21  ;;  %621 = vst [vmem:[#allocation1] ss:$4 sm:$0xff] %v544_v21 }
  0x8f   : > { %v622_v24 = vld.sshfl [vmem:[#allocation1] sm:$0xff pattern:$0x73625140] }
  0x90   : > { %624 = vrot.lane.b32.xlu0 %v622_v24, %s2404_s21  ;;  %643 = vst [vmem:[#allocation1] ss:$4 sm:$0xff] %v545_v23  ;;  %580 = vrot.lane.b32.xlu2 %v578_v20, %s2404_s21  ;;  %v2055_v23 = vld [vmem:[%s2542_s11 + $0x2] sm:$0x3] }
  0x97   : > { %v644_v26 = vld.sshfl [vmem:[#allocation1] sm:$0xff pattern:$0x73625140] }
  0x98   : > { %665 = vst [vmem:[#allocation1] ss:$4 sm:$0xff] %v546_v25  ;;  %646 = vrot.lane.b32.xlu2 %v644_v26, %s2404_s21 }
  0x9f   : > { %v666_v28 = vld.sshfl [vmem:[#allocation1] sm:$0xff pattern:$0x73625140] }
  0xa0   : > { %687 = vst [vmem:[#allocation1] ss:$4 sm:$0xff] %v547_v27  ;;  %v2056_v27 = vld [vmem:[%s2542_s11 + $0x4] sm:$0x3] }
  0xa7   : > { %v688_v30 = vld.sshfl [vmem:[#allocation1] sm:$0xff pattern:$0x73625140] }
  0xa8   : > { %690 = vrot.lane.b32.xlu0 %v688_v30, %s2404_s21  ;;  %709 = vst [vmem:[#allocation1] ss:$4 sm:$0xff] %v548_v29  ;;  %v2021_v29 = vld [vmem:[%s2542_s11 + $0x2] sm:$0x3]  ;;  %v2659_v30 = vld [vmem:[%s3039_s1 + $0x8] sm:$0xf] }
  0xaa   : > { %v234_v31 = vpop.permute.xlu1 %233 }
  0xab   : > { %v241_v32 = vsel %vm239_vm0, %v234_v31, 0  ;;  %v2057_v31 = vld [vmem:[%s2542_s11 + $0x6] sm:$0x3] }
  0xac   : > { %250 = vmatpush.bf16.msra.mxu0 %v241_v32  ;;  %v755_v32 = vsel %vm239_vm0, %v2021_v29, 0 }
  0xaf   : > { %v710_v35 = vld.sshfl [vmem:[#allocation1] sm:$0xff pattern:$0x73625140]  ;;  %1994 = vmatmul.msk.bf16.vlgmr.msra.gmra.mxu0 %vm235_vm1, %v2578_v33 }
  0xb0   : > { %668 = vrot.lane.b32.xlu0 %v666_v28, %s2404_s21  ;;  %712 = vrot.lane.b32.xlu1 %v710_v35, %s2404_s21  ;;  %901 = vst [vmem:[#allocation1] ss:$4 sm:$0xff] %v2038_v34 }
  0xb2   : > { %v261_v36 = vpop.permute.xlu1 %260 }
  0xb3   : > { %v263_v37 = vsel %vm239_vm0, %v261_v36, 0  ;;  %v2058_v36 = vld [vmem:[%s2542_s11 + $0x8] sm:$0x3] }
  0xb4   : > { %272 = vmatpush.bf16.msra.mxu1 %v263_v37 }
  0xb7   : > { %v902_v39 = vld.sshfl [vmem:[#allocation1] sm:$0xff pattern:$0x73625140]  ;;  %1995 = vmatmul.msk.bf16.vlgmr.msra.gmra.mxu1 %vm235_vm1, %v2578_v33 }
  0xb8   : > { %904 = vrot.lane.b32.xlu0 %v902_v39, %s2403_s20  ;;  %926 = vst [vmem:[#allocation1] ss:$4 sm:$0xff] %v2039_v38  ;;  %v2025_v38 = vld [vmem:[%s2542_s11 + $0xa] sm:$0x3] }
  0xb9   : > { %v2059_v39 = vld [vmem:[%s2542_s11 + $0xa] sm:$0x3] }
  0xba   : > { %v283_v40 = vpop.permute.xlu0 %282 }
  0xbb   : > { %v285_v41 = vsel %vm239_vm0, %v283_v40, 0  ;;  %v819_v40 = vsel %vm239_vm0, %v2025_v38, 0 }
  0xbc   : > { %294 = vmatpush.bf16.msra.mxu2 %v285_v41 }
  0xbf   : > { %v927_v43 = vld.sshfl [vmem:[#allocation1] sm:$0xff pattern:$0x73625140]  ;;  %1996 = vmatmul.msk.bf16.vlgmr.msra.gmra.mxu2 %vm235_vm1, %v2578_v33 }
  0xc0   : > { %948 = vst [vmem:[#allocation1] ss:$4 sm:$0xff] %v2040_v42  ;;  %v2060_v42 = vld [vmem:[%s2542_s11 + $0xc] sm:$0x3] }
  0xc2   : > { %v305_v45 = vpop.permute.xlu0 %304  ;;  %v371_v46 = vpop.permute.xlu2 %370 }
  0xc3   : > { %v307_v48 = vsel %vm239_vm0, %v305_v45, 0  ;;  %v373_v49 = vsel %vm239_vm0, %v371_v46, 0  ;;  %v787_v46 = vsel %vm239_vm0, %v2023_v44, 0 }
  0xc4   : > { %316 = vmatpush.bf16.msra.mxu3 %v307_v48  ;;  %382 = vmatpush.bf16.msrb.mxu2 %v373_v49  ;;  %v2690_v49 = vld [vmem:[%s3039_s1 + $0xc] sm:$0xf] }
  0xc7   : > { %v949_v51 = vld.sshfl [vmem:[#allocation1] sm:$0xff pattern:$0x73625140]  ;;  %1997 = vmatmul.msk.bf16.vlgmr.msra.gmra.mxu3 %vm235_vm1, %v2578_v33 }
  0xc8   : > { %455 = vmatpush.bf16.msra.mxu2 %v446_v47  ;;  %951 = vrot.lane.b32.xlu1 %v949_v51, %s2403_s20  ;;  %970 = vst [vmem:[#allocation1] ss:$4 sm:$0xff] %v2041_v50  ;;  %v2027_v47 = vld [vmem:[%s2542_s11 + $0xe] sm:$0x3] }
  0xc9   : > { %v2061_v50 = vld [vmem:[%s2542_s11 + $0xe] sm:$0x3]  ;;  %v851_v51 = vsel %vm239_vm0, %v2027_v47, 0  ;;  %v2771_v47 = vld [vmem:[%s3039_s1 + $0x14] sm:$0xf] }
  0xca   : > { %v327_v53 = vpop.permute.xlu0 %326  ;;  %v393_v55 = vpop.permute.xlu2 %392 }
  0xcb   : > { %v329_v56 = vsel %vm239_vm0, %v327_v53, 0  ;;  %v395_v57 = vsel %vm239_vm0, %v393_v55, 0 }
  0xcc   : > { %338 = vmatpush.bf16.msrb.mxu0 %v329_v56  ;;  %404 = vmatpush.bf16.msrb.mxu3 %v395_v57  ;;  %v771_v57 = vsel %vm239_vm0, %v2022_v52, 0 }
  0xcf   : > { %1998 = vmatmul.msk.bf16.vlgmr.msrb.gmra.mxu0 %vm235_vm1, %v2578_v33  ;;  %v971_v61 = vld.sshfl [vmem:[#allocation1] sm:$0xff pattern:$0x73625140]  ;;  %2000 = vmatmul.msk.bf16.vlgmr.msrb.gmra.mxu2 %vm235_vm1, %v2578_v33 }
  0xd0   : > { %423 = vmatpush.bf16.msra.mxu0 %v414_v54  ;;  %929 = vrot.lane.b32.xlu1 %v927_v43, %s2403_s20  ;;  %992 = vst [vmem:[#allocation1] ss:$4 sm:$0xff] %v2042_v59  ;;  %v2024_v54 = vld [vmem:[%s2542_s11 + $0x8] sm:$0x3]  ;;  %v2026_v59 = vld [vmem:[%s2542_s11 + $0xc] sm:$0x3] }
  0xd1   : > { %973 = vrot.lane.b32.xlu2 %v971_v61, %s2403_s20  ;;  %471 = vmatpush.bf16.msra.mxu3 %v462_v0  ;;  %v803_v58 = vsel %vm239_vm0, %v2024_v54, 0  ;;  %v835_v0 = vsel %vm239_vm0, %v2026_v59, 0  ;;  %v2098_v59 = vld [vmem:[%s2542_s11 + $0x12] sm:$0x3] }
  0xd2   : > { %v349_v2 = vpop.permute.xlu1 %348  ;;  %519 = vmatpush.bf16.msrb.mxu2 %v510_v4 }
  0xd3   : > { %v351_v5 = vsel %vm239_vm0, %v349_v2, 0 }
  0xd4   : > { %487 = vmatpush.bf16.msrb.mxu0 %v478_v60  ;;  %360 = vmatpush.bf16.msrb.mxu1 %v351_v5 }
  0xd7   : > { %v993_v7 = vld.sshfl [vmem:[#allocation1] sm:$0xff pattern:$0x73625140]  ;;  %1999 = vmatmul.msk.bf16.vlgmr.msrb.gmra.mxu1 %vm235_vm1, %v2578_v33  ;;  %2001 = vmatmul.msk.bf16.vlgmr.msrb.gmra.mxu3 %vm235_vm1, %v2578_v33 }
  0xd8   : > { %439 = vmatpush.bf16.msra.mxu1 %v430_v3  ;;  %995 = vrot.lane.b32.xlu1 %v993_v7, %s2403_s20  ;;  %1014 = vst [vmem:[#allocation1] ss:$4 sm:$0xff] %v2043_v6  ;;  %v2091_v6 = vld [vmem:[%s2542_s11 + $0x4] sm:$0x3] }
  0xd9   : > { %535 = vmatpush.bf16.msrb.mxu3 %v526_v14 }
  0xdc   : > { %503 = vmatpush.bf16.msrb.mxu1 %v494_v12  ;;  %v2092_v12 = vld [vmem:[%s2542_s11 + $0x6] sm:$0x3] }
  0xdf   : > { %2002 = vmatmul.msk.bf16.vlgmr.msra.gmra.mxu0 %vm235_vm1, %v218_v8  ;;  %2004 = vmatmul.msk.bf16.vlgmr.msra.gmra.mxu2 %vm235_vm1, %v218_v8  ;;  %v1015_v10 = vld.sshfl [vmem:[#allocation1] sm:$0xff pattern:$0x73625140] }
  0xe0   : > { %1036 = vst [vmem:[#allocation1] ss:$4 sm:$0xff] %v2044_v9 }
  0xe2   : > { %v603_v15 = vpop.permute.xlu2 %602 }
  0xe3   : > { %v605_v16 = vsel %vm239_vm0, %v603_v15, 0 }
  0xe4   : > { %614 = vmatpush.bf16.msra.mxu2 %v605_v16  ;;  %v2737_v16 = vld [vmem:[%s3039_s1 + $0x10] sm:$0xf] }
  0xe7   : > { %v1037_v18 = vld.sshfl [vmem:[#allocation1] sm:$0xff pattern:$0x73625140]  ;;  %2003 = vmatmul.msk.bf16.vlgmr.msra.gmra.mxu1 %vm235_vm1, %v218_v8  ;;  %2005 = vmatmul.msk.bf16.vlgmr.msra.gmra.mxu3 %vm235_vm1, %v218_v8 }
  0xe8   : > { %1039 = vrot.lane.b32.xlu2 %v1037_v18, %s2403_s20  ;;  %1058 = vst [vmem:[#allocation1] ss:$4 sm:$0xff] %v2045_v17  ;;  %v2093_v18 = vld [vmem:[%s2542_s11 + $0x8] sm:$0x3] }
  0xea   : > { %v556_v19 = vpop.permute.xlu1 %555  ;;  %v581_v20 = vpop.permute.xlu2 %580 }
  0xeb   : > { %v561_v21 = vsel %vm239_vm0, %v556_v19, 0  ;;  %v583_v22 = vsel %vm239_vm0, %v581_v20, 0 }
  0xec   : > { %570 = vmatpush.bf16.msra.mxu0 %v561_v21  ;;  %592 = vmatpush.bf16.msra.mxu1 %v583_v22 }
  0xef   : > { %2006 = vmatmul.msk.bf16.vlgmr.msrb.gmra.mxu0 %vm235_vm1, %v218_v8  ;;  %v1059_v24 = vld.sshfl [vmem:[#allocation1] sm:$0xff pattern:$0x73625140]  ;;  %2008 = vmatmul.msk.bf16.vlgmr.msrb.gmra.mxu2 %vm235_vm1, %v218_v8 }
  0xf0   : > { %1061 = vrot.lane.b32.xlu0 %v1059_v24, %s2403_s20  ;;  %1017 = vrot.lane.b32.xlu2 %v1015_v10, %s2403_s20  ;;  %1098 = vst [vmem:[#allocation1] ss:$4 sm:$0xff] %v2055_v23 }
  0xf2   : > { %v647_v25 = vpop.permute.xlu2 %646 }
  0xf3   : > { %v649_v26 = vsel %vm239_vm0, %v647_v25, 0  ;;  %v2094_v25 = vld [vmem:[%s2542_s11 + $0xa] sm:$0x3] }
  0xf4   : > { %658 = vmatpush.bf16.msrb.mxu0 %v649_v26 }
  0xf7   : > { %v1099_v28 = vld.sshfl [vmem:[#allocation1] sm:$0xff pattern:$0x73625140]  ;;  %2007 = vmatmul.msk.bf16.vlgmr.msrb.gmra.mxu1 %vm235_vm1, %v218_v8  ;;  %2009 = vmatmul.msk.bf16.vlgmr.msrb.gmra.mxu3 %vm235_vm1, %v218_v8 }
  0xf8   : > { %1101 = vrot.lane.b32.xlu2 %v1099_v28, %s2404_s21  ;;  %1123 = vst [vmem:[#allocation1] ss:$4 sm:$0xff] %v2056_v27 }
  0xff   : > { %2011 = vmatmul.msk.bf16.vlgmr.msra.gmra.mxu0 %vm235_vm1, %v2659_v30  ;;  %v1124_v33 = vld.sshfl [vmem:[#allocation1] sm:$0xff pattern:$0x73625140]  ;;  %2013 = vmatmul.msk.bf16.vlgmr.msra.gmra.mxu2 %vm235_vm1, %v2659_v30 }
 0x100   : > { %1145 = vst [vmem:[#allocation1] ss:$4 sm:$0xff] %v2057_v31  ;;  %764 = vmatpush.bf16.msra.mxu0 %v755_v32 }
 0x102   : > { %v625_v34 = vpop.permute.xlu0 %624 }
 0x103   : > { %v627_v35 = vsel %vm239_vm0, %v625_v34, 0  ;;  %v2095_v34 = vld [vmem:[%s2542_s11 + $0xc] sm:$0x3] }
 0x104   : > { %636 = vmatpush.bf16.msra.mxu3 %v627_v35 }
 0x107   : > { %v1146_v37 = vld.sshfl [vmem:[#allocation1] sm:$0xff pattern:$0x73625140]  ;;  %2012 = vmatmul.msk.bf16.vlgmr.msra.gmra.mxu1 %vm235_vm1, %v2659_v30  ;;  %2014 = vmatmul.msk.bf16.vlgmr.msra.gmra.mxu3 %vm235_vm1, %v2659_v30 }
 0x108   : > { %1148 = vrot.lane.b32.xlu0 %v1146_v37, %s2404_s21  ;;  %1167 = vst [vmem:[#allocation1] ss:$4 sm:$0xff] %v2058_v36 }
 0x10f   : > { %2015 = vmatmul.msk.bf16.vlgmr.msrb.gmra.mxu0 %vm235_vm1, %v2659_v30  ;;  %v1168_v41 = vld.sshfl [vmem:[#allocation1] sm:$0xff pattern:$0x73625140] }
 0x110   : > { %1126 = vrot.lane.b32.xlu0 %v1124_v33, %s2404_s21  ;;  %1170 = vrot.lane.b32.xlu1 %v1168_v41, %s2404_s21  ;;  %1189 = vst [vmem:[#allocation1] ss:$4 sm:$0xff] %v2059_v39 }
 0x111   : > { %828 = vmatpush.bf16.msrb.mxu0 %v819_v40 }
 0x117   : > { %v1190_v43 = vld.sshfl [vmem:[#allocation1] sm:$0xff pattern:$0x73625140] }
 0x118   : > { %1192 = vrot.lane.b32.xlu0 %v1190_v43, %s2404_s21  ;;  %1211 = vst [vmem:[#allocation1] ss:$4 sm:$0xff] %v2060_v42  ;;  %v2096_v42 = vld [vmem:[%s2542_s11 + $0xe] sm:$0x3] }
 0x11a   : > { %v691_v45 = vpop.permute.xlu0 %690 }
 0x11b   : > { %v693_v48 = vsel %vm239_vm0, %v691_v45, 0 }
 0x11c   : > { %702 = vmatpush.bf16.msrb.mxu2 %v693_v48 }
 0x11f   : > { %2017 = vmatmul.msk.bf16.vlgmr.msrb.gmra.mxu2 %vm235_vm1, %v2659_v30  ;;  %2030 = vmatmul.msk.bf16.vlgmr.msra.gmra.mxu0 %vm235_vm1, %v2690_v49  ;;  %v1212_v53 = vld.sshfl [vmem:[#allocation1] sm:$0xff pattern:$0x73625140] }
 0x120   : > { %796 = vmatpush.bf16.msra.mxu2 %v787_v46  ;;  %1233 = vst [vmem:[#allocation1] ss:$4 sm:$0xff] %v2061_v50  ;;  %v2097_v50 = vld [vmem:[%s2542_s11 + $0x10] sm:$0x3] }
 0x122   : > { %v669_v55 = vpop.permute.xlu0 %668  ;;  %v713_v56 = vpop.permute.xlu1 %712 }
 0x123   : > { %v671_v60 = vsel %vm239_vm0, %v669_v55, 0  ;;  %v715_v61 = vsel %vm239_vm0, %v713_v56, 0 }
 0x124   : > { %860 = vmatpush.bf16.msrb.mxu2 %v851_v51  ;;  %680 = vmatpush.bf16.msrb.mxu1 %v671_v60 }
 0x125   : > { %724 = vmatpush.bf16.msrb.mxu3 %v715_v61 }
 0x127   : > { %2016 = vmatmul.msk.bf16.vlgmr.msrb.gmra.mxu1 %vm235_vm1, %v2659_v30  ;;  %v1234_v2 = vld.sshfl [vmem:[#allocation1] sm:$0xff pattern:$0x73625140] }
 0x128   : > { %780 = vmatpush.bf16.msra.mxu1 %v771_v57  ;;  %2018 = vmatmul.msk.bf16.vlgmr.msrb.gmra.mxu3 %vm235_vm1, %v2659_v30  ;;  %1255 = vst [vmem:[#allocation1] ss:$4 sm:$0xff] %v2062_v63 }
 0x129   : > { %812 = vmatpush.bf16.msra.mxu3 %v803_v58  ;;  %1236 = vrot.lane.b32.xlu1 %v1234_v2, %s2404_s21 }
 0x12a   : > { %v905_v3 = vpop.permute.xlu0 %904 }
 0x12b   : > { %v910_v4 = vsel %vm239_vm0, %v905_v3, 0  ;;  %v974_v8 = vpop.permute.xlu2 %973 }
 0x12c   : > { %844 = vmatpush.bf16.msrb.mxu1 %v835_v0  ;;  %v2715_v5 = vpop.f32.mrf.mxu0  ;;  %919 = vmatpush.bf16.msra.mxu0 %v910_v4  ;;  %v976_v11 = vsel %vm239_vm0, %v974_v8, 0  ;;  %v2108_v4 = vld [vmem:[%s2542_s11 + $0x4] sm:$0x3] }
 0x12d   : > { %876 = vmatpush.bf16.msrb.mxu3 %v867_v1 }
 0x12f   : > { %2032 = vmatmul.msk.bf16.vlgmr.msra.gmra.mxu2 %vm235_vm1, %v2690_v49  ;;  %2034 = vmatmul.msk.bf16.vlgmr.msrb.gmra.mxu0 %vm235_vm1, %v2690_v49  ;;  %v1256_v7 = vld.sshfl [vmem:[#allocation1] sm:$0xff pattern:$0x73625140] }
 0x130   : > { %1258 = vrot.lane.b32.xlu2 %v1256_v7, %s2404_s21  ;;  %1447 = vst [vmem:[#allocation1] ss:$4 sm:$0xff] %v2091_v6 }
 0x131   : > { %1214 = vrot.lane.b32.xlu1 %v1212_v53, %s2404_s21 }
 0x134   : > { %v254_v9 = vpop.f32.mrf.mxu0  ;;  %v2724_v10 = vpop.f32.mrf.mxu1 }
 0x137   : > { %2031 = vmatmul.msk.bf16.vlgmr.msra.gmra.mxu1 %vm235_vm1, %v2690_v49  ;;  %v1448_v13 = vld.sshfl [vmem:[#allocation1] sm:$0xff pattern:$0x73625140] }
 0x138   : > { %2033 = vmatmul.msk.bf16.vlgmr.msra.gmra.mxu3 %vm235_vm1, %v2690_v49  ;;  %1472 = vst [vmem:[#allocation1] ss:$4 sm:$0xff] %v2092_v12 }
 0x139   : > { %1450 = vrot.lane.b32.xlu1 %v1448_v13, %s2403_s20  ;;  %985 = vmatpush.bf16.msra.mxu3 %v976_v11  ;;  %v2109_v11 = vld [vmem:[%s2542_s11 + $0x6] sm:$0x3] }
 0x13a   : > { %v952_v14 = vpop.permute.xlu1 %951 }
 0x13b   : > { %v954_v15 = vsel %vm239_vm0, %v952_v14, 0 }
 0x13c   : > { %963 = vmatpush.bf16.msra.mxu2 %v954_v15  ;;  %v276_v17 = vpop.f32.mrf.mxu1 }
 0x13f   : > { %2036 = vmatmul.msk.bf16.vlgmr.msrb.gmra.mxu2 %vm235_vm1, %v2690_v49  ;;  %2047 = vmatmul.msk.bf16.vlgmr.msra.gmra.mxu0 %vm235_vm1, %v2737_v16  ;;  %v1473_v19 = vld.sshfl [vmem:[#allocation1] sm:$0xff pattern:$0x73625140] }
 0x140   : > { %1494 = vst [vmem:[#allocation1] ss:$4 sm:$0xff] %v2093_v18 }
 0x142   : > { %v930_v20 = vpop.permute.xlu1 %929  ;;  %v1040_v21 = vpop.permute.xlu2 %1039 }
 0x143   : > { %v932_v22 = vsel %vm239_vm0, %v930_v20, 0  ;;  %v1042_v23 = vsel %vm239_vm0, %v1040_v21, 0  ;;  %v296_v24 = vpop.f32.mrf.mxu2 }
 0x144   : > { %941 = vmatpush.bf16.msra.mxu1 %v932_v22  ;;  %1051 = vmatpush.bf16.msrb.mxu2 %v1042_v23  ;;  %v2110_v22 = vld [vmem:[%s2542_s11 + $0x8] sm:$0x3] }
 0x147   : > { %2035 = vmatmul.msk.bf16.vlgmr.msrb.gmra.mxu1 %vm235_vm1, %v2690_v49  ;;  %v1495_v26 = vld.sshfl [vmem:[#allocation1] sm:$0xff pattern:$0x73625140] }
 0x148   : > { %2037 = vmatmul.msk.bf16.vlgmr.msrb.gmra.mxu3 %vm235_vm1, %v2690_v49  ;;  %1516 = vst [vmem:[#allocation1] ss:$4 sm:$0xff] %v2094_v25  ;;  %1497 = vrot.lane.b32.xlu2 %v1495_v26, %s2403_s20 }
 0x14a   : > { %v996_v27 = vpop.permute.xlu1 %995  ;;  %v1018_v28 = vpop.permute.xlu2 %1017 }
 0x14b   : > { %v998_v29 = vsel %vm239_vm0, %v996_v27, 0  ;;  %v1020_v30 = vsel %vm239_vm0, %v1018_v28, 0  ;;  %v298_v31 = vpop.f32.mrf.mxu2  ;;  %v318_v32 = vpop.f32.mrf.mxu3 }
 0x14c   : > { %v340_v33 = vpop.f32.mrf.mxu0  ;;  %1007 = vmatpush.bf16.msrb.mxu0 %v998_v29  ;;  %1029 = vmatpush.bf16.msrb.mxu1 %v1020_v30 }
 0x14f   : > { %2049 = vmatmul.msk.bf16.vlgmr.msra.gmra.mxu2 %vm235_vm1, %v2737_v16  ;;  %2051 = vmatmul.msk.bf16.vlgmr.msrb.gmra.mxu0 %vm235_vm1, %v2737_v16  ;;  %v1517_v35 = vld.sshfl [vmem:[#allocation1] sm:$0xff pattern:$0x73625140] }
 0x150   : > { %1519 = vrot.lane.b32.xlu0 %v1517_v35, %s2403_s20  ;;  %1538 = vst [vmem:[#allocation1] ss:$4 sm:$0xff] %v2095_v34  ;;  %1475 = vrot.lane.b32.xlu2 %v1473_v19, %s2403_s20  ;;  %v2111_v34 = vld [vmem:[%s2542_s11 + $0xa] sm:$0x3]  ;;  %v2074_v35 = vld [vmem:[%s2542_s11 + $0x4] sm:$0x3] }
 0x152   : > { %v1102_v36 = vpop.permute.xlu2 %1101 }
 0x153   : > { %v1107_v37 = vsel %vm239_vm0, %v1102_v36, 0  ;;  %v320_v38 = vpop.f32.mrf.mxu3  ;;  %v384_v39 = vpop.f32.mrf.mxu2 }
 0x154   : > { %v342_v40 = vpop.f32.mrf.mxu0  ;;  %1116 = vmatpush.bf16.msra.mxu0 %v1107_v37  ;;  %v362_v41 = vpop.f32.mrf.mxu1  ;;  %v2077_v37 = vld [vmem:[%s2542_s11 + $0xa] sm:$0x3] }
 0x155   : > { %v1301_v40 = vsel %vm239_vm0, %v2074_v35, 0 }
 0x157   : > { %v1539_v43 = vld.sshfl [vmem:[#allocation1] sm:$0xff pattern:$0x73625140]  ;;  %2048 = vmatmul.msk.bf16.vlgmr.msra.gmra.mxu1 %vm235_vm1, %v2737_v16 }
 0x158   : > { %2050 = vmatmul.msk.bf16.vlgmr.msra.gmra.mxu3 %vm235_vm1, %v2737_v16  ;;  %1560 = vst [vmem:[#allocation1] ss:$4 sm:$0xff] %v2096_v42  ;;  %1541 = vrot.lane.b32.xlu2 %v1539_v43, %s2403_s20 }
 0x15b   : > { %v386_v44 = vpop.f32.mrf.mxu2  ;;  %v406_v45 = vpop.f32.mrf.mxu3 }
 0x15c   : > { %v425_v46 = vpop.f32.mrf.mxu0  ;;  %v364_v48 = vpop.f32.mrf.mxu1 }
 0x15d   : > { %v426_v49 = vadd.f32 %v425_v46, %v2715_v5  ;;  %v2078_v46 = vld [vmem:[%s2542_s11 + $0xc] sm:$0x3] }
 0x15f   : > { %v1561_v51 = vld.sshfl [vmem:[#allocation1] sm:$0xff pattern:$0x73625140]  ;;  %2053 = vmatmul.msk.bf16.vlgmr.msrb.gmra.mxu2 %vm235_vm1, %v2737_v16  ;;  %2064 = vmatmul.msk.bf16.vlgmr.msra.gmra.mxu0 %vm235_vm1, %v2771_v47 }
 0x160   : > { %1582 = vst [vmem:[#allocation1] ss:$4 sm:$0xff] %v2097_v50 }
 0x162   : > { %v1062_v52 = vpop.permute.xlu0 %1061 }
 0x163   : > { %v1064_v53 = vsel %vm239_vm0, %v1062_v52, 0  ;;  %v408_v54 = vpop.f32.mrf.mxu3  ;;  %v457_v55 = vpop.f32.mrf.mxu2  ;;  %v2112_v52 = vld [vmem:[%s2542_s11 + $0xc] sm:$0x3] }
 0x164   : > { %v427_v56 = vpop.f32.mrf.mxu0  ;;  %1073 = vmatpush.bf16.msrb.mxu3 %v1064_v53  ;;  %v458_v57 = vadd.f32 %v457_v55, %v296_v24  ;;  %v441_v58 = vpop.f32.mrf.mxu1  ;;  %v1365_v53 = vsel %vm239_vm0, %v2078_v46, 0  ;;  %v2081_v55 = vld [vmem:[%s2542_s11 + $0x12] sm:$0x3] }
 0x165   : > { %v442_v60 = vadd.f32 %v441_v58, %v2724_v10  ;;  %v2113_v58 = vld [vmem:[%s2542_s11 + $0xe] sm:$0x3] }
 0x167   : > { %2052 = vmatmul.msk.bf16.vlgmr.msrb.gmra.mxu1 %vm235_vm1, %v2737_v16  ;;  %v1583_v61 = vld.sshfl [vmem:[#allocation1] sm:$0xff pattern:$0x73625140] }
 0x168   : > { %2054 = vmatmul.msk.bf16.vlgmr.msrb.gmra.mxu3 %vm235_vm1, %v2737_v16  ;;  %1585 = vrot.lane.b32.xlu0 %v1583_v61, %s2403_s20  ;;  %1604 = vst [vmem:[#allocation1] ss:$4 sm:$0xff] %v2098_v59  ;;  %v1413_v59 = vsel %vm239_vm0, %v2081_v55, 0  ;;  %v2076_v61 = vld [vmem:[%s2542_s11 + $0x8] sm:$0x3] }
 0x16b   : > { %v459_v62 = vpop.f32.mrf.mxu2  ;;  %v473_v63 = vpop.f32.mrf.mxu3 }
 0x16c   : > { %v489_v0 = vpop.f32.mrf.mxu0  ;;  %v2787_v1 = vadd.f32 %v473_v63, %v318_v32  ;;  %v443_v2 = vpop.f32.mrf.mxu1  ;;  %v1333_v63 = vsel %vm239_vm0, %v2076_v61, 0 }
 0x16d   : > { %v2789_v3 = vadd.f32 %v489_v0, %v340_v33  ;;  %v2080_v0 = vld [vmem:[%s2542_s11 + $0x10] sm:$0x3] }
 0x16f   : > { %v1605_v5 = vld.sshfl [vmem:[#allocation1] sm:$0xff pattern:$0x73625140] }
 0x170   : > { %1563 = vrot.lane.b32.xlu0 %v1561_v51, %s2403_s20  ;;  %1607 = vrot.lane.b32.xlu1 %v1605_v5, %s2403_s20  ;;  %1644 = vst [vmem:[#allocation1] ss:$4 sm:$0xff] %v2108_v4  ;;  %v2114_v5 = vld [vmem:[%s2542_s11 + $0x10] sm:$0x3]  ;;  %s1883_s20 = scalar_lea.hbm %s3041_s3, %s2128_s28 }
 0x173   : > { %v475_v6 = vpop.f32.mrf.mxu3  ;;  %v521_v7 = vpop.f32.mrf.mxu2 }
 0x174   : > { %v491_v8 = vpop.f32.mrf.mxu0  ;;  %v2794_v9 = vadd.f32 %v521_v7, %v384_v39  ;;  %v505_v10 = vpop.f32.mrf.mxu1  ;;  %v1397_v6 = vsel %vm239_vm0, %v2080_v0, 0 }
 0x175   : > { %v2797_v12 = vadd.f32 %v505_v10, %v362_v41  ;;  %v1349_v41 = vsel %vm239_vm0, %v2077_v37, 0  ;;  %v2075_v8 = vld [vmem:[%s2542_s11 + $0x6] sm:$0x3] }
 0x177   : > { %v1645_v13 = vld.sshfl [vmem:[#allocation1] sm:$0xff pattern:$0x73625140] }
 0x178   : > { %1647 = vrot.lane.b32.xlu0 %v1645_v13, %s2404_s21  ;;  %1669 = vst [vmem:[#allocation1] ss:$4 sm:$0xff] %v2109_v11  ;;  %v1317_v13 = vsel %vm239_vm0, %v2075_v8, 0 }
 0x17a   : > { %v1149_v14 = vpop.permute.xlu0 %1148 }
 0x17b   : > { %v1151_v15 = vsel %vm239_vm0, %v1149_v14, 0  ;;  %v523_v16 = vpop.f32.mrf.mxu2  ;;  %v537_v17 = vpop.f32.mrf.mxu3 }
 0x17c   : > { %v572_v18 = vpop.f32.mrf.mxu0  ;;  %1160 = vmatpush.bf16.msra.mxu2 %v1151_v15  ;;  %v2801_v19 = vadd.f32 %v537_v17, %v406_v45  ;;  %v507_v20 = vpop.f32.mrf.mxu1  ;;  %v2079_v17 = vld [vmem:[%s2542_s11 + $0xe] sm:$0x3] }
 0x17d   : > { %v2803_v21 = vadd.f32 %v572_v18, %v426_v49 }
 0x17f   : > { %v1670_v23 = vld.sshfl [vmem:[#allocation1] sm:$0xff pattern:$0x73625140]  ;;  %2066 = vmatmul.msk.bf16.vlgmr.msra.gmra.mxu2 %vm235_vm1, %v2771_v47 }
 0x180   : > { %1691 = vst [vmem:[#allocation1] ss:$4 sm:$0xff] %v2110_v22  ;;  %v2115_v22 = vld [vmem:[%s2542_s11 + $0x12] sm:$0x3]  ;;  %s1884_s11 = sshll.u32 %s2955_s27, 4  ;;  %s1885_s11 = int_to_ptr.vmem [resolvable:$true] %s1884_s11 }
 0x182   : > { %v1127_v24 = vpop.permute.xlu0 %1126  ;;  %v1171_v25 = vpop.permute.xlu1 %1170 }
 0x183   : > { %v1129_v26 = vsel %vm239_vm0, %v1127_v24, 0  ;;  %v1173_v27 = vsel %vm239_vm0, %v1171_v25, 0  ;;  %v539_v28 = vpop.f32.mrf.mxu3  ;;  %v616_v29 = vpop.f32.mrf.mxu2 }
 0x184   : > { %v574_v30 = vpop.f32.mrf.mxu0  ;;  %1138 = vmatpush.bf16.msra.mxu1 %v1129_v26  ;;  %1182 = vmatpush.bf16.msra.mxu3 %v1173_v27  ;;  %v2810_v31 = vadd.f32 %v616_v29, %v458_v57  ;;  %v594_v32 = vpop.f32.mrf.mxu1 }
 0x185   : > { %v2812_v33 = vadd.f32 %v594_v32, %v442_v60 }
 0x187   : > { %2065 = vmatmul.msk.bf16.vlgmr.msra.gmra.mxu1 %vm235_vm1, %v2771_v47  ;;  %2067 = vmatmul.msk.bf16.vlgmr.msra.gmra.mxu3 %vm235_vm1, %v2771_v47  ;;  %v1692_v36 = vld.sshfl [vmem:[#allocation1] sm:$0xff pattern:$0x73625140] }
 0x188   : > { %1694 = vrot.lane.b32.xlu1 %v1692_v36, %s2404_s21  ;;  %1713 = vst [vmem:[#allocation1] ss:$4 sm:$0xff] %v2111_v34 }
 0x18a   : > { %v1193_v38 = vpop.permute.xlu0 %1192  ;;  %v1259_v39 = vpop.permute.xlu2 %1258 }
 0x18b   : > { %v1195_v42 = vsel %vm239_vm0, %v1193_v38, 0  ;;  %v1261_v43 = vsel %vm239_vm0, %v1259_v39, 0  ;;  %v618_v44 = vpop.f32.mrf.mxu2  ;;  %v638_v45 = vpop.f32.mrf.mxu3 }
 0x18c   : > { %v660_v48 = vpop.f32.mrf.mxu0  ;;  %1204 = vmatpush.bf16.msrb.mxu0 %v1195_v42  ;;  %1270 = vmatpush.bf16.msrb.mxu3 %v1261_v43  ;;  %v2828_v49 = vadd.f32 %v638_v45, %v2787_v1  ;;  %v596_v50 = vpop.f32.mrf.mxu1 }
 0x18d   : > { %v2831_v51 = vadd.f32 %v660_v48, %v2789_v3  ;;  %v2852_v3 = vld [vmem:[%s3039_s1 + $0x18] sm:$0xf] }
 0x18f   : > { %2068 = vmatmul.msk.bf16.vlgmr.msrb.gmra.mxu0 %vm235_vm1, %v2771_v47  ;;  %v1714_v54 = vld.sshfl [vmem:[#allocation1] sm:$0xff pattern:$0x73625140] }
 0x190   : > { %1310 = vmatpush.bf16.msra.mxu0 %v1301_v40  ;;  %1358 = vmatpush.bf16.msra.mxu3 %v1349_v41  ;;  %1735 = vst [vmem:[#allocation1] ss:$4 sm:$0xff] %v2112_v52 }
 0x191   : > { %1672 = vrot.lane.b32.xlu1 %v1670_v23, %s2404_s21  ;;  %1716 = vrot.lane.b32.xlu2 %v1714_v54, %s2404_s21  ;;  %v1381_v23 = vsel %vm239_vm0, %v2079_v17, 0 }
 0x193   : > { %v640_v56 = vpop.f32.mrf.mxu3 }
 0x194   : > { %1374 = vmatpush.bf16.msrb.mxu0 %v1365_v53  ;;  %v662_v57 = vpop.f32.mrf.mxu0 }
 0x197   : > { %2071 = vmatmul.msk.bf16.vlgmr.msrb.gmra.mxu3 %vm235_vm1, %v2771_v47  ;;  %v1736_v60 = vld.sshfl [vmem:[#allocation1] sm:$0xff pattern:$0x73625140] }
 0x198   : > { %1757 = vst [vmem:[#allocation1] ss:$4 sm:$0xff] %v2113_v58  ;;  %1422 = vmatpush.bf16.msrb.mxu3 %v1413_v59 }
 0x199   : > { %1738 = vrot.lane.b32.xlu1 %v1736_v60, %s2404_s21 }
 0x19b   : > { %v1237_v62 = vpop.permute.xlu1 %1236 }
 0x19c   : > { %v1239_v1 = vsel %vm239_vm0, %v1237_v62, 0  ;;  %v766_v2 = vpop.f32.mrf.mxu0 }
 0x19d   : > { %1248 = vmatpush.bf16.msrb.mxu2 %v1239_v1  ;;  %v2855_v4 = vadd.f32 %v766_v2, %v2803_v21 }
 0x19f   : > { %2083 = vmatmul.msk.bf16.vlgmr.msra.gmra.mxu0 %vm235_vm1, %v2852_v3  ;;  %v1758_v7 = vld.sshfl [vmem:[#allocation1] sm:$0xff pattern:$0x73625140] }
 0x1a0   : > { %2070 = vmatmul.msk.bf16.vlgmr.msrb.gmra.mxu2 %vm235_vm1, %v2771_v47  ;;  %1779 = vst [vmem:[#allocation1] ss:$4 sm:$0xff] %v2114_v5 }
 0x1a1   : > { %1342 = vmatpush.bf16.msra.mxu2 %v1333_v63 }
 0x1a2   : > { %v704_v11 = vpop.f32.mrf.mxu2  ;;  %v1498_v16 = vpop.permute.xlu2 %1497 }
 0x1a3   : > { %v1215_v10 = vpop.permute.xlu1 %1214  ;;  %v736_v15 = vadd.f32 %v704_v11, %v2794_v9  ;;  %v1500_v32 = vsel %vm239_vm0, %v1498_v16, 0  ;;  %v1830_v11 = vld [vmem:[%s3040_s2] sm:$0xff] }
 0x1a4   : > { %v1217_v14 = vsel %vm239_vm0, %v1215_v10, 0  ;;  %v682_v18 = vpop.f32.mrf.mxu1  ;;  %v768_v20 = vpop.f32.mrf.mxu0 }
 0x1a5   : > { %1406 = vmatpush.bf16.msrb.mxu2 %v1397_v6  ;;  %1226 = vmatpush.bf16.msrb.mxu1 %v1217_v14  ;;  %v735_v21 = vadd.f32 %v682_v18, %v2797_v12 }
 0x1a7   : > { %2086 = vmatmul.msk.bf16.vlgmr.msra.gmra.mxu3 %vm235_vm1, %v2852_v3  ;;  %v1780_v24 = vld.sshfl [vmem:[#allocation1] sm:$0xff pattern:$0x73625140] }
 0x1a8   : > { %2069 = vmatmul.msk.bf16.vlgmr.msrb.gmra.mxu1 %vm235_vm1, %v2771_v47  ;;  %1782 = vrot.lane.b32.xlu2 %v1780_v24, %s2404_s21  ;;  %1801 = vst [vmem:[#allocation1] ss:$4 sm:$0xff] %v2115_v22 }
 0x1a9   : > { %1326 = vmatpush.bf16.msra.mxu1 %v1317_v13 }
 0x1aa   : > { %v706_v9 = vpop.f32.mrf.mxu2  ;;  %v1476_v27 = vpop.permute.xlu2 %1475 }
 0x1ab   : > { %v726_v25 = vpop.f32.mrf.mxu3  ;;  %v1451_v12 = vpop.permute.xlu1 %1450  ;;  %v1478_v42 = vsel %vm239_vm0, %v1476_v27, 0 }
 0x1ac   : > { %v737_v26 = vadd.f32 %v726_v25, %v2801_v19  ;;  %v684_v28 = vpop.f32.mrf.mxu1  ;;  %v830_v29 = vpop.f32.mrf.mxu0  ;;  %v1456_v30 = vsel %vm239_vm0, %v1451_v12, 0 }
 0x1ad   : > { %1390 = vmatpush.bf16.msrb.mxu1 %v1381_v23  ;;  %v886_v47 = vadd.f32 %v830_v29, %v2831_v51  ;;  %1465 = vmatpush.bf16.msra.mxu0 %v1456_v30 }
 0x1af   : > { %2087 = vmatmul.msk.bf16.vlgmr.msrb.gmra.mxu0 %vm235_vm1, %v2852_v3  ;;  %v1802_v34 = vld.sshfl [vmem:[#allocation1] sm:$0xff pattern:$0x73625140] }
 0x1b0   : > { %2085 = vmatmul.msk.bf16.vlgmr.msra.gmra.mxu2 %vm235_vm1, %v2852_v3  ;;  %1804 = vrot.lane.b32.xlu0 %v1802_v34, %s2404_s21  ;;  %v2116_v34 = vld [vmem:[%s3039_s1 + $0x20] sm:$0xf] }
 0x1b1   : > { %1760 = vrot.lane.b32.xlu2 %v1758_v7, %s2404_s21  ;;  %1509 = vmatpush.bf16.msra.mxu2 %v1500_v32  ;;  %s1886_s21 = sshll.u32 %s1883_s20, 4  ;;  %s1887_s21 = int_to_ptr.hbm [resolvable:$true] %s1886_s21 }
 0x1b2   : > { %v798_v35 = vpop.f32.mrf.mxu2  ;;  %v1542_v37 = vpop.permute.xlu2 %1541  ;;  %s2291_s19 = sshra.s32 %s1887_s21, 4  ;;  %s2292_s19 = int_to_ptr.hbm [resolvable:$true] %s2291_s19 }
 0x1b3   : > { %v728_v19 = vpop.f32.mrf.mxu3  ;;  %v884_v36 = vadd.f32 %v798_v35, %v2810_v31  ;;  %v1544_v40 = vsel %vm239_vm0, %v1542_v37, 0  ;;  %s2293_s25 = scalar_lea.hbm %s2292_s19, 64  ;;  %p2298_p10 = scmp.lt.s32.totalorder %s2292_s19, %s3041_s3 }
 0x1b4   : > { %v782_v38 = vpop.f32.mrf.mxu1  ;;  %v832_v39 = vpop.f32.mrf.mxu0  ;;  %1553 = vmatpush.bf16.msrb.mxu0 %v1544_v40  ;;  %p2294_p3 = scmp.ne.s32.totalorder %s2292_s19, %s2293_s25  ;;  %p2299_p11 = scmp.lt.s32.totalorder %s2297_s8, %s2293_s25 }
 0x1b5   : > { %v883_v41 = vadd.f32 %v782_v38, %v2812_v33  ;;  %v2099_v33 = vld [vmem:[%s3039_s1 + $0x1c] sm:$0xf] }
 0x1b6   : > { %p2295_p7 = pnand %p2294_p3, %p2510_p12  ;;  %p2300_p13 = por %p2299_p11, %p2298_p10 }
 0x1b7   : > { %2090 = vmatmul.msk.bf16.vlgmr.msrb.gmra.mxu3 %vm235_vm1, %v2852_v3 }
 0x1b8   : > { %2084 = vmatmul.msk.bf16.vlgmr.msra.gmra.mxu1 %vm235_vm1, %v2852_v3  ;;  %p2296_p9 = pneg %p2295_p7 }
 0x1b9   : > { %1487 = vmatpush.bf16.msra.mxu1 %v1478_v42 }
 0x1ba   : > { %v800_v43 = vpop.f32.mrf.mxu2  ;;  %p2301_p0 = pnand %p2300_p13, %p2296_p9 }
 0x1bb   : > { %v814_v44 = vpop.f32.mrf.mxu3 }
 0x1bc   : > { %v885_v31 = vadd.f32 %v814_v44, %v2828_v49  ;;  %v784_v45 = vpop.f32.mrf.mxu1  ;;  %v921_v46 = vpop.f32.mrf.mxu0 }
 0x1bd   : > { %v1079_v48 = vadd.f32 %v921_v46, %v2855_v4 }
 0x1bf   : > { %2100 = vmatmul.msk.bf16.vlgmr.msra.gmra.mxu0 %vm235_vm1, %v2099_v33 }
 0x1c0   : > { %2089 = vmatmul.msk.bf16.vlgmr.msrb.gmra.mxu2 %vm235_vm1, %v2852_v3 }
 0x1c2   : > { %v1520_v50 = vpop.permute.xlu0 %1519  ;;  %v862_v53 = vpop.f32.mrf.mxu2 }
 0x1c3   : > { %v816_v51 = vpop.f32.mrf.mxu3  ;;  %v1522_v52 = vsel %vm239_vm0, %v1520_v50, 0  ;;  %v888_v54 = vadd.f32 %v862_v53, %v736_v15  ;;  %v2405_v15 = vmov 0  }
 0x1c4   : > { %v846_v49 = vpop.f32.mrf.mxu1  ;;  %v923_v55 = vpop.f32.mrf.mxu0  ;;  %1531 = vmatpush.bf16.msra.mxu3 %v1522_v52  ;;  %2246 = vset.pattern.permute.xlu0 %v2405_v15 }
 0x1c5   : > { %v887_v56 = vadd.f32 %v846_v49, %v735_v21  ;;  %1833 = vperm.xlu0 %2246, %v1830_v11  }
 0x1c7   : > { %2103 = vmatmul.msk.bf16.vlgmr.msra.gmra.mxu3 %vm235_vm1, %v2099_v33 }
 0x1c8   : > { %2088 = vmatmul.msk.bf16.vlgmr.msrb.gmra.mxu1 %vm235_vm1, %v2852_v3 }
 0x1ca   : > { %v864_v58 = vpop.f32.mrf.mxu2 }
 0x1cb   : > { %v878_v57 = vpop.f32.mrf.mxu3 }
 0x1cc   : > { %v889_v59 = vadd.f32 %v878_v57, %v737_v26  ;;  %v848_v60 = vpop.f32.mrf.mxu1  ;;  %v1009_v61 = vpop.f32.mrf.mxu0 }
 0x1cd   : > { %v2906_v62 = vadd.f32 %v1009_v61, %v886_v47 }
 0x1cf   : > { %2104 = vmatmul.msk.bf16.vlgmr.msrb.gmra.mxu0 %vm235_vm1, %v2099_v33 }
 0x1d0   : > { %2102 = vmatmul.msk.bf16.vlgmr.msra.gmra.mxu2 %vm235_vm1, %v2099_v33 }
 0x1d2   : > { %v965_v0 = vpop.f32.mrf.mxu2 }
 0x1d3   : > { %v880_v63 = vpop.f32.mrf.mxu3  ;;  %v1081_v1 = vadd.f32 %v965_v0, %v884_v36 }
 0x1d4   : > { %v943_v2 = vpop.f32.mrf.mxu1  ;;  %v1011_v4 = vpop.f32.mrf.mxu0 }
 0x1d5   : > { %v1080_v5 = vadd.f32 %v943_v2, %v883_v41 }
 0x1d8   : > { %2101 = vmatmul.msk.bf16.vlgmr.msra.gmra.mxu1 %vm235_vm1, %v2099_v33 }
 0x1da   : > { %v1586_v3 = vpop.permute.xlu0 %1585  ;;  %v967_v8 = vpop.f32.mrf.mxu2 }
 0x1db   : > { %v987_v6 = vpop.f32.mrf.mxu3  ;;  %v1588_v7 = vsel %vm239_vm0, %v1586_v3, 0 }
 0x1dc   : > { %v1082_v10 = vadd.f32 %v987_v6, %v885_v31  ;;  %v945_v13 = vpop.f32.mrf.mxu1  ;;  %v1118_v14 = vpop.f32.mrf.mxu0  ;;  %1597 = vmatpush.bf16.msrb.mxu2 %v1588_v7 }
 0x1dd   : > { %v2915_v16 = vadd.f32 %v1118_v14, %v1079_v48 }
 0x1e0   : > { %2106 = vmatmul.msk.bf16.vlgmr.msrb.gmra.mxu2 %vm235_vm1, %v2099_v33 }
 0x1e2   : > { %v1564_v17 = vpop.permute.xlu0 %1563  ;;  %v1608_v18 = vpop.permute.xlu1 %1607 }
 0x1e3   : > { %v1566_v20 = vsel %vm239_vm0, %v1564_v17, 0  ;;  %v1610_v21 = vsel %vm239_vm0, %v1608_v18, 0  ;;  %v989_v22 = vpop.f32.mrf.mxu3  ;;  %v1053_v23 = vpop.f32.mrf.mxu2 }
 0x1e4   : > { %v1085_v24 = vadd.f32 %v1053_v23, %v888_v54  ;;  %v1031_v9 = vpop.f32.mrf.mxu1  ;;  %1575 = vmatpush.bf16.msrb.mxu1 %v1566_v20  ;;  %1619 = vmatpush.bf16.msrb.mxu3 %v1610_v21  ;;  %v1120_v25 = vpop.f32.mrf.mxu0 }
 0x1e5   : > { %v1084_v26 = vadd.f32 %v1031_v9, %v887_v56 }
 0x1e7   : > { %2107 = vmatmul.msk.bf16.vlgmr.msrb.gmra.mxu3 %vm235_vm1, %v2099_v33 }
 0x1e8   : > { %2105 = vmatmul.msk.bf16.vlgmr.msrb.gmra.mxu1 %vm235_vm1, %v2099_v33 }
 0x1ea   : > { %v1648_v12 = vpop.permute.xlu0 %1647 }
 0x1eb   : > { %v1717_v27 = vpop.permute.xlu2 %1716  ;;  %v1653_v28 = vsel %vm239_vm0, %v1648_v12, 0  ;;  %v1075_v29 = vpop.f32.mrf.mxu3 }
 0x1ec   : > { %v1719_v30 = vsel %vm239_vm0, %v1717_v27, 0  ;;  %v1055_v47 = vpop.f32.mrf.mxu2  ;;  %v1086_v32 = vadd.f32 %v1075_v29, %v889_v59  ;;  %1662 = vmatpush.bf16.msra.mxu0 %v1653_v28  ;;  %v1033_v19 = vpop.f32.mrf.mxu1 }
 0x1ed   : > { %1728 = vmatpush.bf16.msra.mxu3 %v1719_v30 }
 0x1ef   : > { %2117 = vmatmul.msk.bf16.vlgmr.msra.gmra.mxu0 %vm235_vm1, %v2116_v34 }
 0x1f3   : > { %v1077_v35 = vpop.f32.mrf.mxu3 }
 0x1f7   : > { %2120 = vmatmul.msk.bf16.vlgmr.msra.gmra.mxu3 %vm235_vm1, %v2116_v34 }
 0x1fa   : > { %v1695_v36 = vpop.permute.xlu1 %1694 }
 0x1fb   : > { %v1697_v37 = vsel %vm239_vm0, %v1695_v36, 0 }
 0x1fc   : > { %1706 = vmatpush.bf16.msra.mxu2 %v1697_v37 }
 0x1ff   : > { %2119 = vmatmul.msk.bf16.vlgmr.msra.gmra.mxu2 %vm235_vm1, %v2116_v34 }
 0x202   : > { %v1162_v39 = vpop.f32.mrf.mxu2  ;;  %v1783_v42 = vpop.permute.xlu2 %1782 }
 0x203   : > { %v1673_v38 = vpop.permute.xlu1 %1672  ;;  %v1278_v41 = vadd.f32 %v1162_v39, %v1081_v1  ;;  %v1785_v44 = vsel %vm239_vm0, %v1783_v42, 0 }
 0x204   : > { %v1675_v40 = vsel %vm239_vm0, %v1673_v38, 0  ;;  %v1140_v43 = vpop.f32.mrf.mxu1  ;;  %1794 = vmatpush.bf16.msrb.mxu2 %v1785_v44 }
 0x205   : > { %1684 = vmatpush.bf16.msra.mxu1 %v1675_v40  ;;  %v1277_v31 = vadd.f32 %v1140_v43, %v1080_v5 }
 0x208   : > { %2118 = vmatmul.msk.bf16.vlgmr.msra.gmra.mxu1 %vm235_vm1, %v2116_v34 }
 0x20a   : > { %v1184_v46 = vpop.f32.mrf.mxu3  ;;  %v1164_v51 = vpop.f32.mrf.mxu2 }
 0x20b   : > { %v1739_v45 = vpop.permute.xlu1 %1738  ;;  %v1279_v48 = vadd.f32 %v1184_v46, %v1082_v10  ;;  %v1761_v50 = vpop.permute.xlu2 %1760 }
 0x20c   : > { %v1741_v33 = vsel %vm239_vm0, %v1739_v45, 0  ;;  %v1206_v52 = vpop.f32.mrf.mxu0  ;;  %v1763_v53 = vsel %vm239_vm0, %v1761_v50, 0  ;;  %v1142_v54 = vpop.f32.mrf.mxu1 }
 0x20d   : > { %1750 = vmatpush.bf16.msrb.mxu0 %v1741_v33  ;;  %v1280_v49 = vadd.f32 %v1206_v52, %v2906_v62  ;;  %1772 = vmatpush.bf16.msrb.mxu1 %v1763_v53 }
 0x20f   : > { %2123 = vmatmul.msk.bf16.vlgmr.msrb.gmra.mxu2 %vm235_vm1, %v2116_v34 }
 0x210   : > { %2121 = vmatmul.msk.bf16.vlgmr.msrb.gmra.mxu0 %vm235_vm1, %v2116_v34 }
 0x212   : > { %v1186_v55 = vpop.f32.mrf.mxu3 }
 0x214   : > { %v1208_v56 = vpop.f32.mrf.mxu0 }
 0x218   : > { %2122 = vmatmul.msk.bf16.vlgmr.msrb.gmra.mxu1 %vm235_vm1, %v2116_v34 }
 0x21a   : > { %v1272_v57 = vpop.f32.mrf.mxu3 }
 0x21b   : > { %v1283_v58 = vadd.f32 %v1272_v57, %v1086_v32 }
 0x21c   : > { %v1312_v59 = vpop.f32.mrf.mxu0 }
 0x21d   : > { %v1428_v60 = vadd.f32 %v1312_v59, %v2915_v16 }
 0x222   : > { %v1805_v61 = vpop.permute.xlu0 %1804  ;;  %v1274_v62 = vpop.f32.mrf.mxu3 }
 0x223   : > { %v1250_v63 = vpop.f32.mrf.mxu2  ;;  %v1807_v0 = vsel %vm239_vm0, %v1805_v61, 0 }
 0x224   : > { %v1282_v1 = vadd.f32 %v1250_v63, %v1085_v24  ;;  %v1314_v4 = vpop.f32.mrf.mxu0  ;;  %1816 = vmatpush.bf16.msrb.mxu3 %v1807_v0 }
 0x225   : > { %v1228_v2 = vpop.f32.mrf.mxu1 }
 0x226   : > { %v1281_v5 = vadd.f32 %v1228_v2, %v1084_v26 }
 0x227   : > { %2124 = vmatmul.msk.bf16.vlgmr.msrb.gmra.mxu3 %vm235_vm1, %v2116_v34 }
 0x22a   : > { %v1360_v6 = vpop.f32.mrf.mxu3 }
 0x22b   : > { %v1252_v3 = vpop.f32.mrf.mxu2  ;;  %v1431_v7 = vadd.f32 %v1360_v6, %v1279_v48 }
 0x22c   : > { %v1376_v10 = vpop.f32.mrf.mxu0 }
 0x22d   : > { %v1230_v8 = vpop.f32.mrf.mxu1  ;;  %v2943_v11 = vadd.f32 %v1376_v10, %v1280_v49 }
 0x232   : > { %v1362_v15 = vpop.f32.mrf.mxu3 }
 0x233   : > { %v1344_v13 = vpop.f32.mrf.mxu2 }
 0x234   : > { %v1430_v14 = vadd.f32 %v1344_v13, %v1278_v41  ;;  %v1378_v17 = vpop.f32.mrf.mxu0 }
 0x235   : > { %v1328_v16 = vpop.f32.mrf.mxu1 }
 0x236   : > { %v1429_v18 = vadd.f32 %v1328_v16, %v1277_v31 }
 0x237   : > { %v2949_v44 = vpop.permute.xlu0 %1833 }
 0x23a   : > { %v1424_v21 = vpop.f32.mrf.mxu3 }
 0x23b   : > { %v1346_v20 = vpop.f32.mrf.mxu2  ;;  %v2945_v22 = vadd.f32 %v1424_v21, %v1283_v58 }
 0x23c   : > { %v1467_v24 = vpop.f32.mrf.mxu0 }
 0x23d   : > { %v1330_v23 = vpop.f32.mrf.mxu1  ;;  %v1625_v43 = vadd.f32 %v1467_v24, %v1428_v60 }
 0x242   : > { %v1426_v26 = vpop.f32.mrf.mxu3 }
 0x243   : > { %v1408_v9 = vpop.f32.mrf.mxu2 }
 0x244   : > { %v1434_v25 = vadd.f32 %v1408_v9, %v1282_v1  ;;  %v1469_v27 = vpop.f32.mrf.mxu0 }
 0x245   : > { %v1392_v12 = vpop.f32.mrf.mxu1 }
 0x246   : > { %v1433_v28 = vadd.f32 %v1392_v12, %v1281_v5 }
 0x24a   : > { %v1533_v30 = vpop.f32.mrf.mxu3 }
 0x24b   : > { %v1410_v29 = vpop.f32.mrf.mxu2  ;;  %v1628_v53 = vadd.f32 %v1533_v30, %v1431_v7 }
 0x24c   : > { %v1555_v32 = vpop.f32.mrf.mxu0 }
 0x24d   : > { %v1394_v47 = vpop.f32.mrf.mxu1  ;;  %v1629_v7 = vadd.f32 %v1555_v32, %v2943_v11 }
 0x252   : > { %v1535_v19 = vpop.f32.mrf.mxu3 }
 0x253   : > { %v1511_v34 = vpop.f32.mrf.mxu2 }
 0x254   : > { %v1557_v36 = vpop.f32.mrf.mxu0  ;;  %v1627_v57 = vadd.f32 %v1511_v34, %v1430_v14 }
 0x255   : > { %v1489_v35 = vpop.f32.mrf.mxu1 }
 0x256   : > { %v1626_v61 = vadd.f32 %v1489_v35, %v1429_v18 }
 0x25b   : > { %v1513_v37 = vpop.f32.mrf.mxu2 }
 0x25d   : > { %v1491_v38 = vpop.f32.mrf.mxu1 }
 0x263   : > { %v1599_v39 = vpop.f32.mrf.mxu2 }
 0x264   : > { %v1631_v16 = vadd.f32 %v1599_v39, %v1434_v25 }
 0x265   : > { %v1577_v40 = vpop.f32.mrf.mxu1 }
 0x266   : > { %v1630_v20 = vadd.f32 %v1577_v40, %v1433_v28 }
 0x26a   : > { %v2947_v41 = vpop.f32.mrf.mxu3 }
 0x26b   : > { %v1601_v42 = vpop.f32.mrf.mxu2  ;;  %v1632_v32 = vadd.f32 %v2947_v41, %v2945_v22 }
 0x26c   : > { %v1664_v31 = vpop.f32.mrf.mxu0 }
 0x26d   : > { %v1579_v45 = vpop.f32.mrf.mxu1  ;;  %v1822_v46 = vadd.f32 %v1664_v31, %v1625_v43 }
 0x26f   : > { %v1836_v33 = vadd.f32 %v2949_v44, %v1822_v46 }
 0x271   : > { %v1844_v48 = vmul.f32 0.01, %v1836_v33 }
 0x272   : > { %v1623_v50 = vpop.f32.mrf.mxu3 }
 0x273   : > { %v1852_v51 = vmax.f32 %v1836_v33, %v1844_v48 }
 0x274   : > { %v1666_v52 = vpop.f32.mrf.mxu0 }
 0x275   : > { %1861 = vst.msk [vmem:[%s2955_s27] sm:$0xff] %vm1860_vm2, %v1852_v51 }
 0x27a   : > { %v1730_v54 = vpop.f32.mrf.mxu3 }
 0x27b   : > { %v1825_v49 = vadd.f32 %v1730_v54, %v1628_v53 }
 0x27d   : > { %v1839_v55 = vadd.f32 %v2949_v44, %v1825_v49 }
 0x27f   : > { %v1847_v56 = vmul.f32 0.01, %v1839_v55 }
 0x281   : > { %v1855_v58 = vmax.f32 %v1839_v55, %v1847_v56 }
 0x282   : > { %v1708_v59 = vpop.f32.mrf.mxu2  ;;  %v1732_v60 = vpop.f32.mrf.mxu3 }
 0x283   : > { %1864 = vst.msk [vmem:[%s2955_s27 + $0x18] sm:$0xff] %vm1860_vm2, %v1855_v58  ;;  %v1824_v63 = vadd.f32 %v1708_v59, %v1627_v57 }
 0x285   : > { %v1686_v0 = vpop.f32.mrf.mxu1  ;;  %v1838_v1 = vadd.f32 %v2949_v44, %v1824_v63 }
 0x286   : > { %v1823_v62 = vadd.f32 %v1686_v0, %v1626_v61 }
 0x287   : > { %v1846_v2 = vmul.f32 0.01, %v1838_v1 }
 0x288   : > { %v1837_v4 = vadd.f32 %v2949_v44, %v1823_v62 }
 0x289   : > { %v1854_v5 = vmax.f32 %v1838_v1, %v1846_v2 }
 0x28a   : > { %v1845_v3 = vmul.f32 0.01, %v1837_v4  ;;  %v1710_v6 = vpop.f32.mrf.mxu2 }
 0x28b   : > { %1863 = vst.msk [vmem:[%s2955_s27 + $0x10] sm:$0xff] %vm1860_vm2, %v1854_v5 }
 0x28c   : > { %v1853_v8 = vmax.f32 %v1837_v4, %v1845_v3 }
 0x28d   : > { %v1688_v10 = vpop.f32.mrf.mxu1  ;;  %v1752_v13 = vpop.f32.mrf.mxu0 }
 0x28e   : > { %1862 = vst.msk [vmem:[%s2955_s27 + $0x8] sm:$0xff] %vm1860_vm2, %v1853_v8  ;;  %v1826_v14 = vadd.f32 %v1752_v13, %v1629_v7 }
 0x290   : > { %v1840_v15 = vadd.f32 %v2949_v44, %v1826_v14 }
 0x292   : > { %v1848_v17 = vmul.f32 0.01, %v1840_v15  ;;  %v1796_v18 = vpop.f32.mrf.mxu2 }
 0x293   : > { %v1828_v11 = vadd.f32 %v1796_v18, %v1631_v16 }
 0x294   : > { %v1856_v21 = vmax.f32 %v1840_v15, %v1848_v17 }
 0x295   : > { %v1774_v23 = vpop.f32.mrf.mxu1  ;;  %v1754_v24 = vpop.f32.mrf.mxu0  ;;  %v1842_v9 = vadd.f32 %v2949_v44, %v1828_v11 }
 0x296   : > { %1865 = vst.msk [vmem:[%s2955_s27 + $0x20] sm:$0xff] %vm1860_vm2, %v1856_v21  ;;  %v1827_v26 = vadd.f32 %v1774_v23, %v1630_v20 }
 0x297   : > { %v1850_v12 = vmul.f32 0.01, %v1842_v9 }
 0x298   : > { %v1841_v27 = vadd.f32 %v2949_v44, %v1827_v26 }
 0x299   : > { %v1858_v25 = vmax.f32 %v1842_v9, %v1850_v12 }
 0x29a   : > { %v1849_v29 = vmul.f32 0.01, %v1841_v27  ;;  %v1798_v30 = vpop.f32.mrf.mxu2 }
 0x29b   : > { %1867 = vst.msk [vmem:[%s2955_s27 + $0x30] sm:$0xff] %vm1860_vm2, %v1858_v25 }
 0x29c   : > { %v1857_v28 = vmax.f32 %v1841_v27, %v1849_v29 }
 0x29d   : > { %v1776_v47 = vpop.f32.mrf.mxu1 }
 0x29e   : > { %1866 = vst.msk [vmem:[%s2955_s27 + $0x28] sm:$0xff] %vm1860_vm2, %v1857_v28 }
 0x2aa   : > { %v1818_v34 = vpop.f32.mrf.mxu3 }
 0x2ab   : > { %v1829_v19 = vadd.f32 %v1818_v34, %v1632_v32 }
 0x2ad   : > { %v1843_v35 = vadd.f32 %v2949_v44, %v1829_v19 }
 0x2af   : > { %v1851_v36 = vmul.f32 0.01, %v1843_v35 }
 0x2b1   : > { %v1859_v37 = vmax.f32 %v1843_v35, %v1851_v36 }
 0x2b2   : > { %v1820_v38 = vpop.f32.mrf.mxu3 }
 0x2b3   : > { %1868 = vst.msk [vmem:[%s2955_s27 + $0x38] sm:$0xff] %vm1860_vm2, %v1859_v37 }
 0x2b4   : > { %2304 = shalt.err (!%p2301_p0)
}
 0x2b5   : > { %s2406_s23 = smov 128   ;;  %s2407_s27 = smov 8  }
 0x2b6   : > { %2139 = dma.vmem_to_hbm [thread:$0]  (%p2510_p12), %s1885_s11, 1024, %s1887_s21, %s1870_s18, %s2406_s23, %s2406_s23, %s2407_s27  }
 0x2b7 PF: > { %p2150_p1 = scmp.ge.s32.totalorder %s2399_s22, 2  ;;  %s1901_s30 = sand.u32 1, %s2359_s12  }
 0x2b8   : > { %s1902_s24 = scalar_lea.sflag [#allocation4], %s1901_s30 }
 0x2b9   : > { %p2146_p4 = pnand %p2150_p1, %p2523_p2 }
 0x2bb   : > { %p2147_p5 = pneg %p2146_p4 }
 0x2bd   : > { %2354 = dma.done.wait (%p2147_p5), %s1902_s24, 1024  }
 0x2be   : > { %2356 = vsyncadd (%p2147_p5), %s1902_s24, 4294966272  ;;  %s19_s22 = sadd.s32 1, %s2399_s22   ;;  %s3055_s7 = sld [smem:[#allocation12_spill]] }
 0x2bf   : > { %p16_p6 = scmp.ge.s32.totalorder %s19_s22, 6   ;;  %s3056_s18 = sld [smem:[#allocation8_spill]] }
 0x2c0   : > { %s3057_s19 = sld [smem:[#allocation9_spill]]  ;;  %s3060_s12 = smov %s2363_s13 }
 0x2c1   : > { %s3058_s20 = sld [smem:[#allocation10_spill]]  ;;  %s3061_s13 = smov %s2367_s14 }
 0x2c2   : > { %s3059_s21 = sld [smem:[#allocation11_spill]]  ;;  %s3062_s14 = smov %s2518_s9 }
 0x2c3   : > { %s3063_s15 = smov %s2375_s16  ;;  %s3064_s16 = smov %s2379_s17 }
 0x2c4   : > { %s3065_s17 = smov %s3055_s7  ;;  %18 = sbr.rel (!%p16_p6) target bundleno = 9 (0x9), region = 88 }
 0x2c9   :  { %1908 = vsyncpa [#allocation3], 1 }
 0x2ca   :  { %1910 = vsyncpa [#allocation3 + $0x1], 1 }
 0x2cb   :  { %1911 = vsyncpa [#allocation4], 1 }
 0x2cc   :  { %1913 = vsyncpa [#allocation4 + $0x1], 1 }

</bundles_post_ra>
